<compile_context>
chip_gen: v7x
topology: tpu7x:2x2x1
jax: 0.10.0
libtpu: 0.0.40
codegen_flags: <defaults>
</compile_context>

<pallas_src>
import functools

import jax
import jax.numpy as jnp
import numpy as np
from jax.experimental import pallas as pl
from jax.experimental.pallas import tpu as pltpu

GRID_SIZE = 7
NUMBER_OF_BBOXES = 3
NUMBER_OF_CLASSES = 20
CH = 5 + NUMBER_OF_CLASSES            # 25 channels per anchor
S = GRID_SIZE * GRID_SIZE             # 49 grid cells

# Loss hyper-parameters (the module's only __init__ state).
LAMBDA_COORD = 5.0
LAMBDA_NOOBJ = 0.5
LAMBDA_OBJ = 1.0
LAMBDA_CLASS = 1.0

_ROWS_PER_TILE = 256                  # (image*anchor) groups per grid step


def _reduce_group(t):
    """(TB, C, S) -> (TB, 1, 1): lane reduce then sublane reduce."""
    t = jnp.sum(t, axis=-1, keepdims=True)
    return jnp.sum(t, axis=1, keepdims=True)


def _yolo_loss_kernel(pred_ref, targ_ref, out_ref, *,
                      lambda_coord, lambda_noobj, lambda_obj, lambda_class):
    """Per-(image, anchor) weighted loss partials for a (TB, 25, 49) tile."""
    # Sub-window loads straight from the VMEM block (no value relayouts).
    box_p = pred_ref[:, 0:5, :].astype(jnp.float32)    # (TB, 5, S) x,y,w,h,conf
    box_t = targ_ref[:, 0:5, :].astype(jnp.float32)
    cls_p = pred_ref[:, 5:, :].astype(jnp.float32)     # (TB, 20, S) class logits
    cls_t = targ_ref[:, 5:, :].astype(jnp.float32)

    conf_t = targ_ref[:, 4:5, :].astype(jnp.float32)   # (TB, 1, S)
    obj = (conf_t > 0.0).astype(jnp.float32)
    noobj = (conf_t == 0.0).astype(jnp.float32)

    # ---- fused box(xy, wh) + confidence term -------------------------------
    ch = jax.lax.broadcasted_iota(jnp.int32, (1, 5, 1), 1)   # channel ids 0..4
    is_wh = jnp.logical_and(ch >= 2, ch < 4)
    is_conf = ch == 4

    # sqrt(w/h + 1e-6) only on object cells (mask BEFORE sqrt so masked-out
    # rows cannot inject NaN, matching torch's boolean indexing).
    sqrt_p = jnp.sqrt(jnp.where(obj > 0.0, box_p, 1.0) + 1e-6)
    sqrt_t = jnp.sqrt(jnp.where(obj > 0.0, box_t, 1.0) + 1e-6)
    d = jnp.where(is_wh, sqrt_p, box_p) - jnp.where(is_wh, sqrt_t, box_t)

    # per-element weight: x,y,w,h -> lambda_coord*obj ; conf -> obj/noobj mix
    w = jnp.where(is_conf,
                  lambda_obj * obj + lambda_noobj * noobj,
                  lambda_coord * obj)
    box_part = _reduce_group(w * d * d)                 # (TB, 1, 1)

    # ---- focal-weighted BCE-with-logits over classes, object cells only ----
    x = cls_p
    y = cls_t
    bce = jnp.maximum(x, 0.0) - x * y + jnp.log1p(jnp.exp(-jnp.abs(x)))
    one_m = 1.0 - jnp.exp(-bce)
    focal = bce * (0.25 * one_m * one_m)                # alpha=0.25, gamma=2.0
    cls_part = _reduce_group((lambda_class * obj) * focal)

    out_ref[...] = box_part + cls_part                  # (TB, 1, 1) partials


def yolo_loss_pallas(predictions, target,
                     lambda_coord=LAMBDA_COORD, lambda_noobj=LAMBDA_NOOBJ,
                     lambda_obj=LAMBDA_OBJ, lambda_class=LAMBDA_CLASS):
    """predictions/target: (B, 75, 7, 7) -> scalar loss (YOLOLoss.forward)."""
    B = predictions.shape[0]
    N = B * NUMBER_OF_BBOXES

    # Free, contiguous reshape of the NCHW tensor: (B, 75, 7, 7) -> (B*3, 25, 49).
    pred3 = predictions.reshape(N, CH, S)
    targ3 = target.reshape(N, CH, S)

    tb = min(N, _ROWS_PER_TILE)
    grid = (pl.cdiv(N, tb),)

    kernel = functools.partial(
        _yolo_loss_kernel,
        lambda_coord=float(lambda_coord), lambda_noobj=float(lambda_noobj),
        lambda_obj=float(lambda_obj), lambda_class=float(lambda_class))

    partials = pl.pallas_call(
        kernel,
        out_shape=jax.ShapeDtypeStruct((N, 1, 1), jnp.float32),
        grid=grid,
        in_specs=[
            pl.BlockSpec((tb, CH, S), lambda i: (i, 0, 0)),
            pl.BlockSpec((tb, CH, S), lambda i: (i, 0, 0)),
        ],
        out_specs=pl.BlockSpec((tb, 1, 1), lambda i: (i, 0, 0)),
        compiler_params=pltpu.CompilerParams(
            dimension_semantics=("parallel",)),
    )(pred3, targ3)

    # Tiny epilogue: sum B*3 per-(image, anchor) partials and normalise by B.
    return jnp.sum(partials) / B


def yolo_loss_ref(predictions, target,
                  lambda_coord=LAMBDA_COORD, lambda_noobj=LAMBDA_NOOBJ,
                  lambda_obj=LAMBDA_OBJ, lambda_class=LAMBDA_CLASS):
    """Pure-JAX reference mirroring the PyTorch forward exactly."""
    B = predictions.shape[0]
    pred = jnp.transpose(
        predictions.reshape(-1, NUMBER_OF_BBOXES, CH, GRID_SIZE, GRID_SIZE),
        (0, 3, 4, 1, 2))
    targ = jnp.transpose(
        target.reshape(-1, NUMBER_OF_BBOXES, CH, GRID_SIZE, GRID_SIZE),
        (0, 3, 4, 1, 2))
    pred_boxes, pred_classes = pred[..., :5], pred[..., 5:]
    targ_boxes, targ_classes = targ[..., :5], targ[..., 5:]
    obj = (targ_boxes[..., 4] > 0).astype(jnp.float32)[..., None]
    noobj = (targ_boxes[..., 4] == 0).astype(jnp.float32)[..., None]

    dxy = pred_boxes[..., :2] - targ_boxes[..., :2]
    box_loss = jnp.sum(obj * dxy * dxy)
    p_wh = jnp.where(obj > 0, pred_boxes[..., 2:4], 1.0)
    t_wh = jnp.where(obj > 0, targ_boxes[..., 2:4], 1.0)
    dwh = jnp.sqrt(p_wh + 1e-6) - jnp.sqrt(t_wh + 1e-6)
    box_loss += jnp.sum(obj * dwh * dwh)
    dconf = (pred_boxes[..., 4] - targ_boxes[..., 4])[..., None]
    obj_loss = jnp.sum(obj * dconf * dconf)
    noobj_loss = jnp.sum(noobj * dconf * dconf)
    x, y = pred_classes, targ_classes
    bce = jnp.maximum(x, 0.0) - x * y + jnp.log1p(jnp.exp(-jnp.abs(x)))
    focal = bce * (0.25 * (1.0 - jnp.exp(-bce)) ** 2)
    class_loss = jnp.sum(obj * focal)
    loss = (lambda_coord * box_loss + lambda_obj * obj_loss
            + lambda_noobj * noobj_loss + lambda_class * class_loss)
    return loss / B


if __name__ == "__main__":
    key = jax.random.PRNGKey(0)
    k_pred, k_targ, k_conf, k_mask = jax.random.split(key, 4)

    B = 2
    C = NUMBER_OF_BBOXES * CH  # 75
    shape = (B, C, GRID_SIZE, GRID_SIZE)

    # Predictions: positive so sqrt(w/h + 1e-6) is well-defined (as in trained YOLO).
    predictions = jax.random.uniform(k_pred, shape, jnp.float32, 0.01, 1.0)

    # Targets: uniform boxes/classes; confidence channel either exactly 0 (no-obj)
    # or in (0.5, 1.0] (obj) with ~30% object cells.
    target = jax.random.uniform(k_targ, shape, jnp.float32, 0.0, 1.0)
    target = target.reshape(B, NUMBER_OF_BBOXES, CH, GRID_SIZE, GRID_SIZE)
    obj_cells = (jax.random.uniform(
        k_mask, (B, NUMBER_OF_BBOXES, GRID_SIZE, GRID_SIZE)) < 0.3)
    conf_val = jax.random.uniform(
        k_conf, (B, NUMBER_OF_BBOXES, GRID_SIZE, GRID_SIZE), jnp.float32, 0.5, 1.0)
    conf = jnp.where(obj_cells, conf_val, 0.0)
    target = target.at[:, :, 4, :, :].set(conf).reshape(shape)

    loss_kernel = jax.block_until_ready(yolo_loss_pallas(predictions, target))
    loss_ref = jax.block_until_ready(yolo_loss_ref(predictions, target))

    np.testing.assert_allclose(np.asarray(loss_kernel), np.asarray(loss_ref),
                               rtol=1e-4, atol=1e-4)
    print("KERNEL_OK")
</pallas_src>

<mosaic_0001>
module attributes {stable_mosaic.version = 11 : i64} {
  func.func @_yolo_loss_kernel(%arg0: i32, %arg1: memref<6x25x49xf32, #tpu.memory_space<vmem>>, %arg2: memref<6x25x49xf32, #tpu.memory_space<vmem>>, %arg3: memref<6x1x1xf32, #tpu.memory_space<vmem>>) attributes {dimension_semantics = [#tpu.dimension_semantics<parallel>], iteration_bounds = array<i64: 1>, scalar_prefetch = 0 : i64, scratch_operands = 0 : i64, tpu.core_type = #tpu.core_type<tc>, window_params = [{transform_indices = @transform_0, window_bounds = array<i64: 6, 25, 49>}, {transform_indices = @transform_1, window_bounds = array<i64: 6, 25, 49>}, {transform_indices = @transform_2, window_bounds = array<i64: 6, 1, 1>}]} {
    %c0 = arith.constant 0 : index
    %c0_0 = arith.constant 0 : index
    %c0_1 = arith.constant 0 : index
    %0 = vector.load %arg1[%c0, %c0_0, %c0_1] : memref<6x25x49xf32, #tpu.memory_space<vmem>>, vector<6x5x49xf32>
    %c0_2 = arith.constant 0 : index
    %c0_3 = arith.constant 0 : index
    %c0_4 = arith.constant 0 : index
    %1 = vector.load %arg2[%c0_2, %c0_3, %c0_4] : memref<6x25x49xf32, #tpu.memory_space<vmem>>, vector<6x5x49xf32>
    %c0_5 = arith.constant 0 : index
    %c5 = arith.constant 5 : index
    %c0_6 = arith.constant 0 : index
    %2 = vector.load %arg1[%c0_5, %c5, %c0_6] : memref<6x25x49xf32, #tpu.memory_space<vmem>>, vector<6x20x49xf32>
    %c0_7 = arith.constant 0 : index
    %c5_8 = arith.constant 5 : index
    %c0_9 = arith.constant 0 : index
    %3 = vector.load %arg2[%c0_7, %c5_8, %c0_9] : memref<6x25x49xf32, #tpu.memory_space<vmem>>, vector<6x20x49xf32>
    %c0_10 = arith.constant 0 : index
    %c4 = arith.constant 4 : index
    %c0_11 = arith.constant 0 : index
    %4 = vector.load %arg2[%c0_10, %c4, %c0_11] : memref<6x25x49xf32, #tpu.memory_space<vmem>>, vector<6x1x49xf32>
    %cst = arith.constant 0.000000e+00 : f32
    %5 = vector.broadcast %cst : f32 to vector<6x1x49xf32>
    %6 = arith.cmpf ogt, %4, %5 : vector<6x1x49xf32>
    %7 = arith.extui %6 : vector<6x1x49xi1> to vector<6x1x49xi32>
    %8 = arith.sitofp %7 : vector<6x1x49xi32> to vector<6x1x49xf32>
    %cst_12 = arith.constant 0.000000e+00 : f32
    %9 = vector.broadcast %cst_12 : f32 to vector<6x1x49xf32>
    %10 = arith.cmpf oeq, %4, %9 : vector<6x1x49xf32>
    %11 = arith.extui %10 : vector<6x1x49xi1> to vector<6x1x49xi32>
    %12 = arith.sitofp %11 : vector<6x1x49xi32> to vector<6x1x49xf32>
    %13 = tpu.iota {dimensions = array<i32: 1>} : vector<1x5x1xi32>
    %c2_i32 = arith.constant 2 : i32
    %14 = vector.broadcast %c2_i32 : i32 to vector<1x5x1xi32>
    %15 = arith.cmpi sge, %13, %14 : vector<1x5x1xi32>
    %c4_i32 = arith.constant 4 : i32
    %16 = vector.broadcast %c4_i32 : i32 to vector<1x5x1xi32>
    %17 = arith.cmpi slt, %13, %16 : vector<1x5x1xi32>
    %18 = arith.andi %15, %17 : vector<1x5x1xi1>
    %c4_i32_13 = arith.constant 4 : i32
    %19 = vector.broadcast %c4_i32_13 : i32 to vector<1x5x1xi32>
    %20 = arith.cmpi eq, %13, %19 : vector<1x5x1xi32>
    %cst_14 = arith.constant 0.000000e+00 : f32
    %21 = vector.broadcast %cst_14 : f32 to vector<6x1x49xf32>
    %22 = arith.cmpf ogt, %8, %21 : vector<6x1x49xf32>
    %cst_15 = arith.constant 1.000000e+00 : f32
    %23 = vector.shape_cast %22 : vector<6x1x49xi1> to vector<6x1x49xi1>
    %24 = vector.broadcast %23 : vector<6x1x49xi1> to vector<6x5x49xi1>
    %25 = vector.broadcast %cst_15 : f32 to vector<6x5x49xf32>
    %26 = arith.select %24, %0, %25 : vector<6x5x49xi1>, vector<6x5x49xf32>
    %cst_16 = arith.constant 9.99999997E-7 : f32
    %27 = vector.broadcast %cst_16 : f32 to vector<6x5x49xf32>
    %28 = arith.addf %26, %27 : vector<6x5x49xf32>
    %29 = math.sqrt %28 : vector<6x5x49xf32>
    %cst_17 = arith.constant 0.000000e+00 : f32
    %30 = vector.broadcast %cst_17 : f32 to vector<6x1x49xf32>
    %31 = arith.cmpf ogt, %8, %30 : vector<6x1x49xf32>
    %cst_18 = arith.constant 1.000000e+00 : f32
    %32 = vector.shape_cast %31 : vector<6x1x49xi1> to vector<6x1x49xi1>
    %33 = vector.broadcast %32 : vector<6x1x49xi1> to vector<6x5x49xi1>
    %34 = vector.broadcast %cst_18 : f32 to vector<6x5x49xf32>
    %35 = arith.select %33, %1, %34 : vector<6x5x49xi1>, vector<6x5x49xf32>
    %cst_19 = arith.constant 9.99999997E-7 : f32
    %36 = vector.broadcast %cst_19 : f32 to vector<6x5x49xf32>
    %37 = arith.addf %35, %36 : vector<6x5x49xf32>
    %38 = math.sqrt %37 : vector<6x5x49xf32>
    %39 = vector.shape_cast %18 : vector<1x5x1xi1> to vector<1x5x1xi1>
    %40 = vector.broadcast %39 : vector<1x5x1xi1> to vector<6x5x49xi1>
    %41 = arith.select %40, %29, %0 : vector<6x5x49xi1>, vector<6x5x49xf32>
    %42 = vector.shape_cast %18 : vector<1x5x1xi1> to vector<1x5x1xi1>
    %43 = vector.broadcast %42 : vector<1x5x1xi1> to vector<6x5x49xi1>
    %44 = arith.select %43, %38, %1 : vector<6x5x49xi1>, vector<6x5x49xf32>
    %45 = arith.subf %41, %44 : vector<6x5x49xf32>
    %cst_20 = arith.constant 1.000000e+00 : f32
    %46 = vector.broadcast %cst_20 : f32 to vector<6x1x49xf32>
    %47 = arith.mulf %46, %8 : vector<6x1x49xf32>
    %cst_21 = arith.constant 5.000000e-01 : f32
    %48 = vector.broadcast %cst_21 : f32 to vector<6x1x49xf32>
    %49 = arith.mulf %48, %12 : vector<6x1x49xf32>
    %50 = arith.addf %47, %49 : vector<6x1x49xf32>
    %cst_22 = arith.constant 5.000000e+00 : f32
    %51 = vector.broadcast %cst_22 : f32 to vector<6x1x49xf32>
    %52 = arith.mulf %51, %8 : vector<6x1x49xf32>
    %53 = vector.shape_cast %20 : vector<1x5x1xi1> to vector<1x5x1xi1>
    %54 = vector.broadcast %53 : vector<1x5x1xi1> to vector<6x5x49xi1>
    %55 = vector.shape_cast %50 : vector<6x1x49xf32> to vector<6x1x49xf32>
    %56 = vector.broadcast %55 : vector<6x1x49xf32> to vector<6x5x49xf32>
    %57 = vector.shape_cast %52 : vector<6x1x49xf32> to vector<6x1x49xf32>
    %58 = vector.broadcast %57 : vector<6x1x49xf32> to vector<6x5x49xf32>
    %59 = arith.select %54, %56, %58 : vector<6x5x49xi1>, vector<6x5x49xf32>
    %60 = arith.mulf %59, %45 : vector<6x5x49xf32>
    %61 = arith.mulf %60, %45 : vector<6x5x49xf32>
    %cst_23 = arith.constant dense<0.000000e+00> : vector<6x5xf32>
    %62 = vector.multi_reduction <add>, %61, %cst_23 [2] : vector<6x5x49xf32> to vector<6x5xf32>
    %63 = vector.shape_cast %62 : vector<6x5xf32> to vector<6x5x1xf32>
    %cst_24 = arith.constant dense<0.000000e+00> : vector<6x1xf32>
    %64 = vector.multi_reduction <add>, %63, %cst_24 [1] : vector<6x5x1xf32> to vector<6x1xf32>
    %65 = vector.shape_cast %64 : vector<6x1xf32> to vector<6x1x1xf32>
    %cst_25 = arith.constant 0.000000e+00 : f32
    %66 = vector.broadcast %cst_25 : f32 to vector<6x20x49xf32>
    %67 = arith.maximumf %2, %66 : vector<6x20x49xf32>
    %68 = arith.mulf %2, %3 : vector<6x20x49xf32>
    %69 = arith.subf %67, %68 : vector<6x20x49xf32>
    %70 = math.absf %2 : vector<6x20x49xf32>
    %cst_26 = arith.constant 0.000000e+00 : f32
    %71 = vector.broadcast %cst_26 : f32 to vector<6x20x49xf32>
    %72 = arith.subf %71, %70 : vector<6x20x49xf32>
    %73 = math.exp %72 : vector<6x20x49xf32>
    %74 = math.log1p %73 : vector<6x20x49xf32>
    %75 = arith.addf %69, %74 : vector<6x20x49xf32>
    %cst_27 = arith.constant 0.000000e+00 : f32
    %76 = vector.broadcast %cst_27 : f32 to vector<6x20x49xf32>
    %77 = arith.subf %76, %75 : vector<6x20x49xf32>
    %78 = math.exp %77 : vector<6x20x49xf32>
    %cst_28 = arith.constant 1.000000e+00 : f32
    %79 = vector.broadcast %cst_28 : f32 to vector<6x20x49xf32>
    %80 = arith.subf %79, %78 : vector<6x20x49xf32>
    %cst_29 = arith.constant 2.500000e-01 : f32
    %81 = vector.broadcast %cst_29 : f32 to vector<6x20x49xf32>
    %82 = arith.mulf %81, %80 : vector<6x20x49xf32>
    %83 = arith.mulf %82, %80 : vector<6x20x49xf32>
    %84 = arith.mulf %75, %83 : vector<6x20x49xf32>
    %cst_30 = arith.constant 1.000000e+00 : f32
    %85 = vector.broadcast %cst_30 : f32 to vector<6x1x49xf32>
    %86 = arith.mulf %85, %8 : vector<6x1x49xf32>
    %87 = vector.broadcast %86 : vector<6x1x49xf32> to vector<6x20x49xf32>
    %88 = arith.mulf %87, %84 : vector<6x20x49xf32>
    %cst_31 = arith.constant dense<0.000000e+00> : vector<6x20xf32>
    %89 = vector.multi_reduction <add>, %88, %cst_31 [2] : vector<6x20x49xf32> to vector<6x20xf32>
    %90 = vector.shape_cast %89 : vector<6x20xf32> to vector<6x20x1xf32>
    %cst_32 = arith.constant dense<0.000000e+00> : vector<6x1xf32>
    %91 = vector.multi_reduction <add>, %90, %cst_32 [1] : vector<6x20x1xf32> to vector<6x1xf32>
    %92 = vector.shape_cast %91 : vector<6x1xf32> to vector<6x1x1xf32>
    %93 = arith.addf %65, %92 : vector<6x1x1xf32>
    %c0_33 = arith.constant 0 : index
    %c0_34 = arith.constant 0 : index
    %c0_35 = arith.constant 0 : index
    %94 = vector.load %arg3[%c0_33, %c0_34, %c0_35] : memref<6x1x1xf32, #tpu.memory_space<vmem>>, vector<6x1x1xf32>
    tpu.vector_store %arg3[%c0_33, %c0_34, %c0_35], %93 {strides = array<i32>} : memref<6x1x1xf32, #tpu.memory_space<vmem>>, vector<6x1x1xf32>,
    return
  }
  func.func @transform_0(%arg0: i32) -> (i32, i32, i32) {
    %c0_i32 = arith.constant 0 : i32
    %c0_i32_0 = arith.constant 0 : i32
    %c0_i32_1 = arith.constant 0 : i32
    return %arg0, %c0_i32, %c0_i32_0 : i32, i32, i32
  }
  func.func @transform_1(%arg0: i32) -> (i32, i32, i32) {
    %c0_i32 = arith.constant 0 : i32
    %c0_i32_0 = arith.constant 0 : i32
    %c0_i32_1 = arith.constant 0 : i32
    return %arg0, %c0_i32, %c0_i32_0 : i32, i32, i32
  }
  func.func @transform_2(%arg0: i32) -> (i32, i32, i32) {
    %c0_i32 = arith.constant 0 : i32
    %c0_i32_0 = arith.constant 0 : i32
    %c0_i32_1 = arith.constant 0 : i32
    return %arg0, %c0_i32, %c0_i32_0 : i32, i32, i32
  }
}

</mosaic_0001>

<bundles_post_ra>
// kernel: tpu_custom_call.1
= control target key start
LH: loop header
LB: loop body
LE: loop exit
PB: predicated region body
PF: predicated region fallthrough
CT: control target
= control target key end

     0   :  { %7 = vsyncpa [#allocation3], 0  ;;  %s2108_s0 = inlined_call_operand.hbm [shape: f32[6,25,49], index: 0, kind: input, shape index: {}]   ;;  %s2109_s1 = inlined_call_operand.hbm [shape: f32[6,25,49], index: 1, kind: input, shape index: {}]   ;;  %s2110_s2 = inlined_call_operand.vmem [shape: f32[6,1,1], index: 2, kind: output, shape index: {}]  }
   0x1   :  { %8 = vsyncpa [#allocation5], 0  ;;  %s1255_s9 = smov [#allocation2]   ;;  %s1207_s13 = scalar_lea.hbm %s2108_s0, 3072 }
   0x2   :  { %s14_s10 = sshll.u32 %s1255_s9, 4  ;;  %p1208_p0 = scmp.ne.s32.totalorder %s2108_s0, %s1207_s13  ;;  %s15_s10 = int_to_ptr.vmem [resolvable:$true] %s14_s10 }
   0x3   :  { %p1211_p1 = scmp.lt.u32.totalorder %s1207_s13, %s2108_s0 }
   0x5   :  { %p1213_p2 = pnand %p1211_p1, %p1208_p0 }
   0x7   :  { %1216 = shalt.err (!%p1213_p2)
}
   0x8   :  { %s1217_s18 = scalar_lea.vmem %s15_s10, 3072  ;;  %p1222_p4 = scmp.lt.s32.totalorder %s15_s10, %s15_s10 }
   0x9   :  { %p1218_p3 = scmp.ne.s32.totalorder %s15_s10, %s1217_s18  ;;  %p1223_p5 = scmp.lt.s32.totalorder %s1217_s18, %s1217_s18 }
   0xb   :  { %p1224_p6 = por %p1223_p5, %p1222_p4 }
   0xd   :  { %p1225_p7 = pnand %p1224_p6, %p1218_p3 }
   0xf   :  { %1228 = shalt.err (!%p1225_p7)
}
  0x10   :  { %s1256_s19 = smov 128   ;;  %s1257_s20 = smov 8  }
  0x11   :  { %20 = dma.hbm_to_vmem [thread:$0]  %s2108_s0, 3072, %s15_s10, [#allocation3], %s1256_s19, %s1256_s19, %s1257_s20  }
  0x12   :  { %s1258_s23 = smov [#allocation4]   ;;  %s1229_s27 = scalar_lea.hbm %s2109_s1, 3072 }
  0x13   :  { %s26_s24 = sshll.u32 %s1258_s23, 4  ;;  %p1230_p8 = scmp.ne.s32.totalorder %s2109_s1, %s1229_s27  ;;  %s27_s24 = int_to_ptr.vmem [resolvable:$true] %s26_s24 }
  0x14   :  { %p1233_p9 = scmp.lt.u32.totalorder %s1229_s27, %s2109_s1 }
  0x16   :  { %p1235_p10 = pnand %p1233_p9, %p1230_p8 }
  0x18   :  { %1238 = shalt.err (!%p1235_p10)
}
  0x19   :  { %s1239_s4 = scalar_lea.vmem %s27_s24, 3072  ;;  %p1244_p12 = scmp.lt.s32.totalorder %s27_s24, %s27_s24 }
  0x1a   :  { %p1240_p11 = scmp.ne.s32.totalorder %s27_s24, %s1239_s4  ;;  %p1245_p13 = scmp.lt.s32.totalorder %s1239_s4, %s1239_s4 }
  0x1c   :  { %p1246_p0 = por %p1245_p13, %p1244_p12 }
  0x1e   :  { %p1247_p1 = pnand %p1246_p0, %p1240_p11 }
  0x20   :  { %1250 = shalt.err (!%p1247_p1)
}
  0x21   :  { %32 = dma.hbm_to_vmem [thread:$0]  %s2109_s1, 3072, %s27_s24, [#allocation5], %s1256_s19, %s1256_s19, %s1257_s20  }
  0x22   :  { %1251 = dma.done.wait [#allocation3], 3072  }
  0x23   :  { %1252 = vsyncadd [#allocation3], 4294964224 }
  0x24   :  { %1253 = dma.done.wait [#allocation5], 3072  }
  0x25   :  { %1254 = vsyncadd [#allocation5], 4294964224  ;;  %v129_v0 = vlaneseq  ;;  %v88_v2 = vld [vmem:[#allocation4 + $0x24] sm:$0x1]  ;;  %v1259_v4 = vmov 0.0   ;;  %v1260_v9 = vmov 0  }
  0x26   :  { %vm94_vm0 = vcmp.gt.f32.partialorder %v88_v2, 0.0  ;;  %vm112_vm1 = vcmp.eq.f32.partialorder %v88_v2, 0.0  ;;  %v87_v7 = vld [vmem:[#allocation4 + $0x4] sm:$0x1] }
  0x27   :  { %v1300_v1 = vshrl.u32 %v129_v0, 7  ;;  %v1306_v5 = vsel %vm94_vm0, 1.0, %v1259_v4  ;;  %v1064_v6 = vsel %vm112_vm1, 1.0, %v1259_v4  ;;  %vm93_vm3 = vcmp.gt.f32.partialorder %v87_v7, 0.0  ;;  %v90_v12 = vld [vmem:[#allocation4 + $0x64] sm:$0x1] }
  0x28   :  { %vm136_vm2 = vcmp.gt.f32.partialorder %v1306_v5, 0.0  ;;  %v306_v8 = vmul.f32 0.5, %v1064_v6  ;;  %v1312_v11 = vsel %vm93_vm3, 1.0, %v1259_v4  ;;  %vm111_vm4 = vcmp.eq.f32.partialorder %v87_v7, 0.0  ;;  %v1314_v13 = vld [vmem:[#allocation2 + $0x20] sm:$0x1f] }
  0x29   :  { %v1303_v3 = vsub.s32 0, %v1300_v1  ;;  %v142_v10 = vsel %vm136_vm2, 1, %v1260_v9  ;;  %v1316_v14 = vld [vmem:[#allocation4 + $0x20] sm:$0x1f]  ;;  %v1063_v16 = vsel %vm111_vm4, 1.0, %v1259_v4  ;;  %v318_v17 = vmul.f32 5.0, %v1306_v5 }
  0x2a   :  { %vm135_vm5 = vcmp.gt.f32.partialorder %v1312_v11, 0.0  ;;  %vm96_vm6 = vcmp.gt.f32.partialorder %v90_v12, 0.0  ;;  %v312_v18 = vadd.f32 %v1306_v5, %v306_v8  ;;  %v305_v20 = vmul.f32 0.5, %v1063_v16  ;;  %v1335_v28 = vld [vmem:[#allocation2] sm:$0x1f] }
  0x2b   :  { %v154_v15 = vrot.slane %v142_v10, %v1303_v3  ;;  %v141_v19 = vsel %vm135_vm5, 1, %v1260_v9  ;;  %v1328_v24 = vsel %vm96_vm6, 1.0, %v1259_v4  ;;  %v356_v27 = vrot.slane %v318_v17, %v1303_v3  ;;  %v1337_v29 = vld [vmem:[#allocation4] sm:$0x1f] }
  0x2c   :  { %v150_v23 = vrot.slane %v141_v19, %v1303_v3  ;;  %v332_v30 = vrot.slane %v312_v18, %v1303_v3  ;;  %v317_v31 = vmul.f32 5.0, %v1312_v11  ;;  %vm138_vm9 = vcmp.gt.f32.partialorder %v1328_v24, 0.0  ;;  %v89_v33 = vld [vmem:[#allocation4 + $0x44] sm:$0x1] }
  0x2d   :  { %vm172_vm7 = vcmp.eq.s32.totalorder %v154_v15, 1  ;;  %vm134_vm10 = vcmp.eq.s32.totalorder %v1300_v1, 4  ;;  %v311_v32 = vadd.f32 %v1312_v11, %v305_v20  ;;  %vm131_vm11 = vcmp.ge.s32.totalorder %v1300_v1, 2  ;;  %v1365_v43 = vld [vmem:[#allocation2 + $0x60] sm:$0x1f] }
  0x2e   :  { %v178_v21 = vsel %vm172_vm7, %v1314_v13, 1.0  ;;  %v232_v22 = vsel %vm172_vm7, %v1316_v14, 1.0  ;;  %vm171_vm8 = vcmp.eq.s32.totalorder %v150_v23, 1  ;;  %vm132_vm12 = vcmp.lt.s32.totalorder %v1300_v1, 4  ;;  %v1367_v44 = vld [vmem:[#allocation4 + $0x60] sm:$0x1f] }
  0x2f   :  { %v1330_v25 = vadd.f32 1e-06, %v178_v21  ;;  %v1332_v26 = vadd.f32 1e-06, %v232_v22  ;;  %v177_v34 = vsel %vm171_vm8, %v1335_v28, 1.0  ;;  %v231_v35 = vsel %vm171_vm8, %v1337_v29, 1.0  ;;  %vm1403_vm8 = vmand %vm131_vm11, %vm132_vm12 }
  0x30   :  { %v1350_v36 = vadd.f32 1e-06, %v177_v34  ;;  %v1352_v37 = vadd.f32 1e-06, %v231_v35  ;;  %vm114_vm13 = vcmp.eq.f32.partialorder %v90_v12, 0.0  ;;  %v144_v38 = vsel %vm138_vm9, 1, %v1260_v9 }
  0x31   :  { %1075 = vrsqrt.f32 %v1330_v25  ;;  %v1357_v39 = vsel %vm134_vm10, %v332_v30, %v356_v27  ;;  %v352_v40 = vrot.slane %v317_v31, %v1303_v3  ;;  %v162_v41 = vrot.slane %v144_v38, %v1303_v3  ;;  %v1411_v2 = vld [vmem:[#allocation2 + $0x40] sm:$0x1f] }
  0x32   :  { %1077 = vrsqrt.f32 %v1332_v26  ;;  %vm95_vm14 = vcmp.gt.f32.partialorder %v89_v33, 0.0  ;;  %vm198_vm15 = vcmp.eq.f32.partialorder %v1330_v25, inf  ;;  %vm200_vm0 = vcmp.eq.f32.partialorder %v1330_v25, 0.0  ;;  %v1413_v6 = vld [vmem:[#allocation4 + $0x40] sm:$0x1f] }
  0x33   :  { %1079 = vrsqrt.f32 %v1350_v36  ;;  %v328_v42 = vrot.slane %v311_v32, %v1303_v3  ;;  %v201_v45 = vand.u32 2147483648, %v1330_v25  ;;  %vm252_vm1 = vcmp.eq.f32.partialorder %v1332_v26, inf }
  0x34   :  { %1081 = vrsqrt.f32 %v1352_v37  ;;  %v1066_v46 = vsel %vm114_vm13, 1.0, %v1259_v4  ;;  %vm254_vm2 = vcmp.eq.f32.partialorder %v1332_v26, 0.0  ;;  %v255_v47 = vand.u32 2147483648, %v1332_v26 }
  0x35   :  { %vm174_vm3 = vcmp.eq.s32.totalorder %v162_v41, 1  ;;  %v1376_v48 = vsel %vm95_vm14, 1.0, %v1259_v4  ;;  %vm113_vm4 = vcmp.eq.f32.partialorder %v89_v33, 0.0  ;;  %v308_v53 = vmul.f32 0.5, %v1066_v46  ;;  %v1445_v33 = vld [vmem:[#allocation2 + $0x25] sm:$0xff] }
  0x36   :  { %v180_v49 = vsel %vm174_vm3, %v1365_v43, 1.0  ;;  %v234_v50 = vsel %vm174_vm3, %v1367_v44, 1.0  ;;  %vm137_vm5 = vcmp.gt.f32.partialorder %v1376_v48, 0.0  ;;  %vm191_vm6 = vcmp.eq.f32.partialorder %v1350_v36, inf }
  0x37   :  { %v1381_v51 = vadd.f32 1e-06, %v180_v49  ;;  %v1383_v52 = vadd.f32 1e-06, %v234_v50  ;;  %v143_v54 = vsel %vm137_vm5, 1, %v1260_v9  ;;  %v1389_v56 = vsel %vm134_vm10, %v328_v42, %v352_v40 }
  0x38   :  { %v1392_v57 = vmul.f32 5.0, %v1328_v24  ;;  %v158_v58 = vrot.slane %v143_v54, %v1303_v3  ;;  %vm193_vm7 = vcmp.eq.f32.partialorder %v1350_v36, 0.0  ;;  %v1065_v61 = vsel %vm113_vm4, 1.0, %v1259_v4  ;;  %v1477_v54 = vld [vmem:[#allocation2 + $0x5] sm:$0xff] }
  0x39   :  { %1083 = vrsqrt.f32 %v1381_v51  ;;  %vm391_vm9 = vcmask 397312   ;;  %v194_v0 = vand.u32 2147483648, %v1350_v36  ;;  %vm245_vm13 = vcmp.eq.f32.partialorder %v1352_v37, inf }
  0x3a   :  { %1085 = vrsqrt.f32 %v1383_v52  ;;  %vm247_vm11 = vcmp.eq.f32.partialorder %v1352_v37, 0.0  ;;  %v248_v8 = vand.u32 2147483648, %v1352_v37  ;;  %v314_v10 = vadd.f32 %v1328_v24, %v308_v53 }
  0x3b   :  { %v1076_v55 = vpop.eup %1075  ;;  %vm173_vm12 = vcmp.eq.s32.totalorder %v158_v58, 1  ;;  %v307_v16 = vmul.f32 0.5, %v1065_v61  ;;  %v364_v32 = vrot.slane %v1392_v57, %v1303_v3  ;;  %v1452_v34 = vmul.f32 5.0, %v1376_v48 }
  0x3c   :  { %v1078_v59 = vpop.eup %1077  ;;  %v197_v60 = vmul.f32 %v1076_v55, %v1330_v25  ;;  %v179_v20 = vsel %vm173_vm12, %v1411_v2, 1.0  ;;  %v233_v21 = vsel %vm173_vm12, %v1413_v6, 1.0  ;;  %v456_v35 = vmax.f32 %v1445_v33, 0.0 }
  0x3d   :  { %v251_v63 = vmul.f32 %v1078_v59, %v1332_v26  ;;  %v1080_v17 = vpop.eup %1079  ;;  %v1437_v27 = vadd.f32 1e-06, %v179_v20  ;;  %v1439_v30 = vadd.f32 1e-06, %v233_v21  ;;  %vm212_vm14 = vcmp.eq.f32.partialorder %v1381_v51, inf }
  0x3e   :  { %v199_v7 = vsel %vm198_vm15, %v1330_v25, %v197_v60  ;;  %v1082_v22 = vpop.eup %1081  ;;  %v190_v25 = vmul.f32 %v1080_v17, %v1350_v36  ;;  %vm214_vm15 = vcmp.eq.f32.partialorder %v1381_v51, 0.0  ;;  %v215_v49 = vand.u32 2147483648, %v1381_v51 }
  0x3f   :  { %v202_v12 = vsel %vm200_vm0, %v201_v45, %v199_v7  ;;  %v253_v15 = vsel %vm252_vm1, %v1332_v26, %v251_v63  ;;  %v244_v31 = vmul.f32 %v1082_v22, %v1352_v37  ;;  %1087 = vrsqrt.f32 %v1437_v27 }
  0x40   :  { %v256_v18 = vsel %vm254_vm2, %v255_v47, %v253_v15  ;;  %v288_v19 = vsel %vm1403_vm8, %v202_v12, %v1314_v13  ;;  %v340_v13 = vrot.slane %v314_v10, %v1303_v3  ;;  %1089 = vrsqrt.f32 %v1439_v30 }
  0x41   :  { %v294_v23 = vsel %vm1403_vm8, %v256_v18, %v1316_v14  ;;  %v192_v14 = vsel %vm191_vm6, %v1350_v36, %v190_v25  ;;  %v246_v41 = vsel %vm245_vm13, %v1352_v37, %v244_v31  ;;  %vm266_vm0 = vcmp.eq.f32.partialorder %v1383_v52, inf }
  0x42   :  { %v300_v26 = vsub.f32 %v288_v19, %v294_v23  ;;  %v195_v40 = vsel %vm193_vm7, %v194_v0, %v192_v14  ;;  %v249_v42 = vsel %vm247_vm11, %v248_v8, %v246_v41  ;;  %vm268_vm1 = vcmp.eq.f32.partialorder %v1383_v52, 0.0 }
  0x43   :  { %v287_v45 = vsel %vm1403_vm8, %v195_v40, %v1335_v28  ;;  %v1084_v46 = vpop.eup %1083  ;;  %v293_v47 = vsel %vm1403_vm8, %v249_v42, %v1337_v29  ;;  %v269_v28 = vand.u32 2147483648, %v1383_v52  ;;  %v510_v29 = vand.u32 2147483647, %v1445_v33  ;;  %v69_v42 = vld [vmem:[#allocation4 + $0x5] sm:$0xff] }
  0x44   :  { %v380_v38 = vmul.f32 %v1357_v39, %v300_v26  ;;  %v313_v39 = vadd.f32 %v1376_v48, %v307_v16  ;;  %v1086_v37 = vpop.eup %1085  ;;  %v299_v50 = vsub.f32 %v287_v45, %v293_v47  ;;  %v211_v53 = vmul.f32 %v1084_v46, %v1381_v51  ;;  %v1499_v16 = vld [vmem:[#allocation2 + $0x2d] sm:$0xff] }
  0x45   :  { %v265_v57 = vmul.f32 %v1086_v37, %v1383_v52  ;;  %v376_v60 = vsel %vm134_vm10, %v340_v13, %v364_v32  ;;  %v528_v7 = vsub.f32 0.0, %v510_v29  ;;  %v507_v8 = vand.u32 2147483647, %v1477_v54  ;;  %v72_v13 = vld [vmem:[#allocation4 + $0x25] sm:$0xff] }
  0x46   :  { %v386_v36 = vmul.f32 %v380_v38, %v300_v26  ;;  %v379_v58 = vmul.f32 %v1389_v56, %v299_v50  ;;  %v213_v59 = vsel %vm212_vm14, %v1381_v51, %v211_v53  ;;  %v336_v61 = vrot.slane %v313_v39, %v1303_v3  ;;  %v1524_v39 = vld [vmem:[#allocation2 + $0x4d] sm:$0xff] }
  0x47   :  { %v216_v63 = vsel %vm214_vm15, %v215_v49, %v213_v59  ;;  %v267_v0 = vsel %vm266_vm0, %v1383_v52, %v265_v57  ;;  %v360_v15 = vrot.slane %v1452_v34, %v1303_v3  ;;  %vm205_vm2 = vcmp.eq.f32.partialorder %v1437_v27, inf  ;;  %v73_v49 = vld [vmem:[#allocation4 + $0x2d] sm:$0xff] }
  0x48   :  { %v395_v55 = vsel %vm391_vm9, %v386_v36, 0.0  ;;  %v385_v10 = vmul.f32 %v379_v58, %v299_v50  ;;  %v270_v12 = vsel %vm268_vm1, %v269_v28, %v267_v0  ;;  %v290_v56 = vsel %vm1403_vm8, %v216_v63, %v1365_v43  ;;  %v1542_v58 = vld [vmem:[#allocation2 + $0x6d] sm:$0xff] }
  0x49   :  { %396 = vadd.xlane.f32.xlu1 %v395_v55  ;;  %v296_v51 = vsel %vm1403_vm8, %v270_v12, %v1367_v44  ;;  %v549_v52 = vmul.f32 1.442695, %v528_v7  ;;  %v525_v17 = vsub.f32 0.0, %v507_v8  ;;  %v1088_v18 = vpop.eup %1087  ;;  %vm207_vm3 = vcmp.eq.f32.partialorder %v1437_v27, 0.0  ;;  %v1510_v44 = vld [vmem:[#allocation2 + $0xd] sm:$0xff]  ;;  %v1535_v55 = vld [vmem:[#allocation2 + $0x45] sm:$0xff] }
  0x4a   :  { %v392_v19 = vsel %vm391_vm9, %v385_v10, 0.0  ;;  %v302_v20 = vsub.f32 %v290_v56, %v296_v51  ;;  %v208_v43 = vand.u32 2147483648, %v1437_v27  ;;  %v204_v21 = vmul.f32 %v1088_v18, %v1437_v27  ;;  %v1090_v25 = vpop.eup %1089  ;;  %v70_v56 = vld [vmem:[#allocation4 + $0xd] sm:$0xff] }
  0x4b   :  { %393 = vadd.xlane.f32.xlu0 %v392_v19  ;;  %1091 = vpow2.f32 %v549_v52  ;;  %v543_v22 = vmul.f32 1.442695, %v525_v17  ;;  %v511_v23 = vand.u32 2147483647, %v1499_v16  ;;  %vm259_vm4 = vcmp.eq.f32.partialorder %v1439_v30, inf  ;;  %v76_v18 = vld [vmem:[#allocation4 + $0x4d] sm:$0xff] }
  0x4c   :  { %v382_v26 = vmul.f32 %v376_v60, %v302_v20  ;;  %vm261_vm5 = vcmp.eq.f32.partialorder %v1439_v30, 0.0  ;;  %v262_v31 = vand.u32 2147483648, %v1439_v30  ;;  %v206_v32 = vsel %vm205_vm2, %v1437_v27, %v204_v21 }
  0x4d   :  { %v258_v14 = vmul.f32 %v1090_v25, %v1439_v30  ;;  %1093 = vpow2.f32 %v543_v22  ;;  %v529_v34 = vsub.f32 0.0, %v511_v23  ;;  %v209_v40 = vsel %vm207_vm3, %v208_v43, %v206_v32  ;;  %v79_v25 = vld [vmem:[#allocation4 + $0x6d] sm:$0xff] }
  0x4e   :  { %v388_v38 = vmul.f32 %v382_v26, %v302_v20  ;;  %v375_v41 = vsel %vm134_vm10, %v336_v61, %v360_v15  ;;  %v508_v45 = vand.u32 2147483647, %v1510_v44  ;;  %v289_v36 = vsel %vm1403_vm8, %v209_v40, %v1411_v2  ;;  %v1567_v26 = vld [vmem:[#allocation2 + $0x65] sm:$0xff] }
  0x4f   :  { %v260_v46 = vsel %vm259_vm4, %v1439_v30, %v258_v14  ;;  %v474_v47 = vmul.f32 %v72_v13, %v1445_v33  ;;  %v551_v37 = vmul.f32 1.442695, %v529_v34  ;;  %v453_v53 = vmax.f32 %v1477_v54, 0.0  ;;  %v75_v33 = vld [vmem:[#allocation4 + $0x45] sm:$0xff] }
  0x50   :  { %v401_v27 = vsel %vm391_vm9, %v388_v38, 0.0  ;;  %v263_v50 = vsel %vm261_vm5, %v262_v31, %v260_v46  ;;  %v526_v28 = vsub.f32 0.0, %v508_v45  ;;  %v471_v2 = vmul.f32 %v69_v42, %v1477_v54 }
  0x51   :  { %402 = vadd.xlane.f32.xlu1 %v401_v27  ;;  %v295_v57 = vsel %vm1403_vm8, %v263_v50, %v1413_v6  ;;  %1095 = vpow2.f32 %v551_v37  ;;  %v514_v29 = vand.u32 2147483647, %v1524_v39  ;;  %v457_v30 = vmax.f32 %v1499_v16, 0.0 }
  0x52   :  { %v301_v59 = vsub.f32 %v289_v36, %v295_v57  ;;  %v475_v60 = vmul.f32 %v73_v49, %v1499_v16  ;;  %v545_v61 = vmul.f32 1.442695, %v526_v28  ;;  %v513_v0 = vand.u32 2147483647, %v1535_v55  ;;  %v1590_v57 = vld [vmem:[#allocation2 + $0x8d] sm:$0xff] }
  0x53   :  { %v532_v63 = vsub.f32 0.0, %v514_v29  ;;  %v1549_v6 = vrot.slane %v1306_v5, %v1303_v3  ;;  %v517_v54 = vand.u32 2147483647, %v1542_v58  ;;  %v1554_v10 = vsub.f32 %v456_v35, %v474_v47 }
  0x54   :  { %v381_v7 = vmul.f32 %v375_v41, %v301_v59  ;;  %1097 = vpow2.f32 %v545_v61  ;;  %v1556_v12 = vsub.f32 %v453_v53, %v471_v2  ;;  %v531_v16 = vsub.f32 0.0, %v513_v0 }
  0x55   :  { %v1092_v8 = vpop.eup %1091  ;;  %v557_v15 = vmul.f32 1.442695, %v532_v63  ;;  %v1560_v17 = vrot.slane %v1312_v11, %v1303_v3  ;;  %v1562_v5 = vsub.f32 %v457_v30, %v475_v60  ;;  %v454_v20 = vmax.f32 %v1510_v44, 0.0 }
  0x56   :  { %v387_v51 = vmul.f32 %v381_v7, %v301_v59  ;;  %v606_v52 = vadd.f32 1.0, %v1092_v8  ;;  %v555_v35 = vmul.f32 1.442695, %v531_v16  ;;  %v535_v43 = vsub.f32 0.0, %v517_v54 }
  0x57   :  { %v1094_v19 = vpop.eup %1093  ;;  %1099 = vpow2.f32 %v557_v15  ;;  %v609_v22 = vmul.f32 -0.5, %v1092_v8  ;;  %v472_v23 = vmul.f32 %v70_v56, %v1510_v44  ;;  %v460_v31 = vmax.f32 %v1524_v39, 0.0 }
  0x58   :  { %v398_v21 = vsel %vm391_vm9, %v387_v51, 0.0  ;;  %1101 = vlog2.f32 %v606_v52  ;;  %v579_v11 = vadd.f32 1.0, %v1094_v19  ;;  %v478_v13 = vmul.f32 %v76_v18, %v1524_v39 }
  0x59   :  { %399 = vadd.xlane.f32.xlu0 %v398_v21  ;;  %1103 = vpow2.f32 %v555_v35  ;;  %v459_v32 = vmax.f32 %v1535_v55, 0.0  ;;  %v477_v14 = vmul.f32 %v75_v33, %v1535_v55  ;;  %v463_v34 = vmax.f32 %v1542_v58, 0.0  ;;  %v78_v55 = vld [vmem:[#allocation4 + $0x65] sm:$0xff] }
  0x5a   :  { %v563_v38 = vmul.f32 1.442695, %v535_v43  ;;  %1105 = vlog2.f32 %v579_v11  ;;  %v582_v44 = vmul.f32 -0.5, %v1094_v19  ;;  %v481_v41 = vmul.f32 %v79_v25, %v1542_v58 }
  0x5b   :  { %v1096_v40 = vpop.eup %1095  ;;  %v516_v42 = vand.u32 2147483647, %v1567_v26  ;;  %v610_v45 = vadd.f32 1.0, %v609_v22  ;;  %v612_v46 = vand.u32 2147483647, %v1092_v8  ;;  %v1576_v47 = vsub.f32 %v454_v20, %v472_v23 }
  0x5c   :  { %v615_v36 = vadd.f32 1.0, %v1096_v40  ;;  %1107 = vpow2.f32 %v563_v38  ;;  %v618_v39 = vmul.f32 -0.5, %v1096_v40  ;;  %v1580_v49 = vrot.slane %v1376_v48, %v1303_v3 }
  0x5d   :  { %v534_v37 = vsub.f32 0.0, %v516_v42  ;;  %v1582_v50 = vsub.f32 %v460_v31, %v478_v13  ;;  %v1584_v53 = vsub.f32 %v459_v32, %v477_v14  ;;  %v1588_v28 = vrot.slane %v1328_v24, %v1303_v3 }
  0x5e   :  { %v1098_v27 = vpop.eup %1097  ;;  %1109 = vlog2.f32 %v615_v36  ;;  %v583_v2 = vadd.f32 1.0, %v582_v44  ;;  %v585_v29 = vand.u32 2147483647, %v1094_v19  ;;  %v611_v48 = vmul.f32 %v1092_v8, %v610_v45 }
  0x5f   :  { %v588_v58 = vadd.f32 1.0, %v1098_v27  ;;  %v561_v59 = vmul.f32 1.442695, %v534_v37  ;;  %vm1592_vm6 = vcmp.lt.f32.partialorder %v612_v46, 0.0004427343  ;;  %v1596_v61 = vsub.f32 %v463_v34, %v481_v41 }
  0x60   :  { %v621_v60 = vand.u32 2147483647, %v1096_v40  ;;  %v619_v0 = vadd.f32 1.0, %v618_v39  ;;  %v462_v24 = vmax.f32 %v1567_v26, 0.0  ;;  %v520_v7 = vand.u32 2147483647, %v1590_v57 }
  0x61   :  { %v1100_v63 = vpop.eup %1099  ;;  %1111 = vlog2.f32 %v588_v58  ;;  %v591_v56 = vmul.f32 -0.5, %v1098_v27  ;;  %v1601_v16 = vmul.f32 %v78_v55, %v1567_v26  ;;  %v584_v52 = vmul.f32 %v1094_v19, %v583_v2  ;;  %v82_v19 = vld [vmem:[#allocation4 + $0x8d] sm:$0xff]  ;;  %v1630_v37 = vld [vmem:[#allocation4 + $0x84] sm:$0x1] }
  0x62   :  { %v1102_v54 = vpop.eup %1101  ;;  %v642_v15 = vadd.f32 1.0, %v1100_v63  ;;  %1113 = vpow2.f32 %v561_v59  ;;  %vm1605_vm7 = vcmp.lt.f32.partialorder %v585_v29, 0.0004427343  ;;  %v538_v20 = vsub.f32 0.0, %v520_v7 }
  0x63   :  { %v1603_v8 = vpop.eup %1103  ;;  %v608_v51 = vmul.f32 0.6931472, %v1102_v54  ;;  %vm1609_vm13 = vcmp.lt.f32.partialorder %v621_v60, 0.0004427343  ;;  %v594_v35 = vand.u32 2147483647, %v1098_v27  ;;  %v620_v23 = vmul.f32 %v1096_v40, %v619_v0 }
  0x64   :  { %1115 = vlog2.f32 %v642_v15  ;;  %v633_v43 = vadd.f32 1.0, %v1603_v8  ;;  %v1106_v21 = vpop.eup %1105  ;;  %v645_v25 = vmul.f32 -0.5, %v1100_v63  ;;  %v569_v11 = vmul.f32 1.442695, %v538_v20  ;;  %v1643_v0 = vld [vmem:[#allocation2 + $0x85] sm:$0xff] }
  0x65   :  { %v614_v22 = vsel %vm1592_vm6, %v611_v48, %v608_v51  ;;  %v581_v32 = vmul.f32 0.6931472, %v1106_v21  ;;  %v592_v14 = vadd.f32 1.0, %v591_v56  ;;  %v648_v34 = vand.u32 2147483647, %v1100_v63 }
  0x66   :  { %v1108_v31 = vpop.eup %1107  ;;  %v1617_v13 = vadd.f32 %v614_v22, %v1554_v10  ;;  %1117 = vlog2.f32 %v633_v43  ;;  %v636_v38 = vmul.f32 -0.5, %v1603_v8  ;;  %v466_v41 = vmax.f32 %v1590_v57, 0.0 }
  0x67   :  { %v669_v44 = vadd.f32 1.0, %v1108_v31  ;;  %v587_v40 = vsel %vm1605_vm7, %v584_v52, %v581_v32  ;;  %v1625_v46 = vmul.f32 %v82_v19, %v1590_v57  ;;  %1119 = vpow2.f32 %v569_v11 }
  0x68   :  { %v1110_v42 = vpop.eup %1109  ;;  %v762_v45 = vsub.f32 0.0, %v1617_v13  ;;  %v1628_v10 = vadd.f32 %v587_v40, %v1556_v12  ;;  %v646_v39 = vadd.f32 1.0, %v645_v25  ;;  %v593_v2 = vmul.f32 %v1098_v27, %v592_v14 }
  0x69   :  { %v617_v36 = vmul.f32 0.6931472, %v1110_v42  ;;  %1121 = vlog2.f32 %v669_v44  ;;  %vm1632_vm11 = vcmp.lt.f32.partialorder %v594_v35, 0.0004427343  ;;  %v672_v58 = vmul.f32 -0.5, %v1108_v31 }
  0x6a   :  { %v783_v55 = vmul.f32 1.442695, %v762_v45  ;;  %v759_v48 = vsub.f32 0.0, %v1628_v10  ;;  %vm1639_vm12 = vcmp.lt.f32.partialorder %v648_v34, 0.0004427343  ;;  %v637_v60 = vadd.f32 1.0, %v636_v38 }
  0x6b   :  { %v1112_v59 = vpop.eup %1111  ;;  %v623_v30 = vsel %vm1609_vm13, %v620_v23, %v617_v36  ;;  %v639_v56 = vand.u32 2147483647, %v1603_v8  ;;  %vm97_vm14 = vcmp.gt.f32.partialorder %v1630_v37, 0.0  ;;  %v647_v51 = vmul.f32 %v1100_v63, %v646_v39 }
  0x6c   :  { %v1114_v7 = vpop.eup %1113  ;;  %1123 = vpow2.f32 %v783_v55  ;;  %v1646_v27 = vadd.f32 %v623_v30, %v1562_v5  ;;  %v590_v54 = vmul.f32 0.6931472, %v1112_v59  ;;  %v777_v15 = vmul.f32 1.442695, %v759_v48 }
  0x6d   :  { %v675_v52 = vand.u32 2147483647, %v1108_v31  ;;  %v660_v18 = vadd.f32 1.0, %v1114_v7  ;;  %v673_v43 = vadd.f32 1.0, %v672_v58  ;;  %v519_v21 = vand.u32 2147483647, %v1643_v0 }
  0x6e   :  { %v1116_v20 = vpop.eup %1115  ;;  %v763_v33 = vsub.f32 0.0, %v1646_v27  ;;  %v596_v35 = vsel %vm1632_vm11, %v593_v2, %v590_v54  ;;  %1125 = vpow2.f32 %v777_v15  ;;  %v638_v23 = vmul.f32 %v1603_v8, %v637_v60 }
  0x6f   :  { %v1655_v5 = vadd.f32 %v596_v35, %v1576_v47  ;;  %v644_v22 = vmul.f32 0.6931472, %v1116_v20  ;;  %vm1658_vm15 = vcmp.lt.f32.partialorder %v639_v56, 0.0004427343  ;;  %1127 = vlog2.f32 %v660_v18  ;;  %v1709_v35 = vld [vmem:[#allocation2 + $0xa5] sm:$0xff] }
  0x70   :  { %v1118_v25 = vpop.eup %1117  ;;  %v785_v63 = vmul.f32 1.442695, %v763_v33  ;;  %v663_v11 = vmul.f32 -0.5, %v1114_v7  ;;  %v537_v38 = vsub.f32 0.0, %v519_v21  ;;  %v674_v44 = vmul.f32 %v1108_v31, %v673_v43 }
  0x71   :  { %v760_v32 = vsub.f32 0.0, %v1655_v5  ;;  %v650_v14 = vsel %vm1639_vm12, %v647_v51, %v644_v22  ;;  %v635_v34 = vmul.f32 0.6931472, %v1118_v25  ;;  %v1665_v47 = vpop.eup %1119  ;;  %vm1670_vm0 = vcmp.lt.f32.partialorder %v675_v52, 0.0004427343 }
  0x72   :  { %1129 = vpow2.f32 %v785_v63  ;;  %v1668_v8 = vadd.f32 %v650_v14, %v1582_v50  ;;  %v666_v39 = vand.u32 2147483647, %v1114_v7  ;;  %v696_v55 = vadd.f32 1.0, %v1665_v47 }
  0x73   :  { %v1122_v45 = vpop.eup %1121  ;;  %v779_v40 = vmul.f32 1.442695, %v760_v32  ;;  %v641_v36 = vsel %vm1658_vm15, %v638_v23, %v635_v34  ;;  %v664_v58 = vadd.f32 1.0, %v663_v11  ;;  %v498_v31 = vsub.f32 %v462_v24, %v1601_v16 }
  0x74   :  { %v766_v2 = vsub.f32 0.0, %v1668_v8  ;;  %v1679_v29 = vadd.f32 %v641_v36, %v1584_v53  ;;  %v671_v50 = vmul.f32 0.6931472, %v1122_v45  ;;  %v699_v59 = vmul.f32 -0.5, %v1665_v47  ;;  %v1688_v53 = vld [vmem:[#allocation2 + $0xad] sm:$0xff] }
  0x75   :  { %1131 = vpow2.f32 %v779_v40  ;;  %v567_v48 = vmul.f32 1.442695, %v537_v38  ;;  %vm927_vm1 = vcmask 400384   ;;  %v1696_v26 = vsel %vm97_vm14, 1.0, %v1259_v4 }
  0x76   :  { %v1124_v30 = vpop.eup %1123  ;;  %v791_v12 = vmul.f32 1.442695, %v766_v2  ;;  %v765_v60 = vsub.f32 0.0, %v1679_v29  ;;  %v677_v54 = vsel %vm1670_vm0, %v674_v44, %v671_v50  ;;  %1133 = vlog2.f32 %v696_v55 }
  0x77   :  { %v816_v56 = vsub.f32 1.0, %v1124_v30  ;;  %v1691_v15 = vadd.f32 %v677_v54, %v1596_v61  ;;  %v1701_v24 = vsub.f32 %v466_v41, %v1625_v46  ;;  %v665_v51 = vmul.f32 %v1114_v7, %v664_v58 }
  0x78   :  { %1135 = vpow2.f32 %v791_v12  ;;  %v789_v16 = vmul.f32 1.442695, %v765_v60  ;;  %vm1703_vm2 = vcmp.lt.f32.partialorder %v666_v39, 0.0004427343  ;;  %v1126_v18 = vpop.eup %1125  ;;  %v523_v33 = vand.u32 2147483647, %v1688_v53 }
  0x79   :  { %v834_v61 = vmul.f32 0.25, %v816_v56  ;;  %v769_v20 = vsub.f32 0.0, %v1691_v15  ;;  %1137 = vpow2.f32 %v567_v48  ;;  %v1128_v43 = vpop.eup %1127  ;;  %v813_v57 = vsub.f32 1.0, %v1126_v18 }
  0x7a   :  { %1139 = vpow2.f32 %v789_v16  ;;  %v700_v41 = vadd.f32 1.0, %v699_v59  ;;  %v702_v46 = vand.u32 2147483647, %v1665_v47  ;;  %v662_v22 = vmul.f32 0.6931472, %v1128_v43 }
  0x7b   :  { %v852_v7 = vmul.f32 %v834_v61, %v816_v56  ;;  %v797_v21 = vmul.f32 1.442695, %v769_v20  ;;  %v541_v23 = vsub.f32 0.0, %v523_v33  ;;  %v831_v63 = vmul.f32 0.25, %v813_v57 }
  0x7c   :  { %v1130_v25 = vpop.eup %1129  ;;  %v1714_v19 = vrot.slane %v1696_v26, %v1303_v3  ;;  %v465_v11 = vmax.f32 %v1643_v0, 0.0  ;;  %v522_v32 = vand.u32 2147483647, %v1709_v35  ;;  %v668_v38 = vsel %vm1703_vm2, %v665_v51, %v662_v22 }
  0x7d   :  { %v870_v14 = vmul.f32 %v852_v7, %v1617_v13  ;;  %v817_v34 = vsub.f32 1.0, %v1130_v25  ;;  %1141 = vpow2.f32 %v797_v21  ;;  %v849_v44 = vmul.f32 %v831_v63, %v813_v57  ;;  %v81_v13 = vld [vmem:[#allocation4 + $0x85] sm:$0xff]  ;;  %v1745_v21 = vld [vmem:[#allocation4 + $0xa4] sm:$0x1] }
  0x7e   :  { %v1721_v42 = vadd.f32 %v668_v38, %v498_v31  ;;  %v701_v45 = vmul.f32 %v1665_v47, %v700_v41  ;;  %v575_v40 = vmul.f32 1.442695, %v541_v23  ;;  %vm1725_vm3 = vcmp.lt.f32.partialorder %v702_v46, 0.0004427343 }
  0x7f   :  { %v1132_v36 = vpop.eup %1131  ;;  %v912_v39 = vmul.f32 %v1549_v6, %v870_v14  ;;  %v835_v55 = vmul.f32 0.25, %v817_v34  ;;  %v540_v50 = vsub.f32 0.0, %v522_v32  ;;  %v867_v59 = vmul.f32 %v849_v44, %v1628_v10  ;;  %v85_v32 = vld [vmem:[#allocation4 + $0xad] sm:$0xff] }
  0x80   :  { %v1134_v58 = vpop.eup %1133  ;;  %v814_v48 = vsub.f32 1.0, %v1132_v36  ;;  %v768_v31 = vsub.f32 0.0, %v1721_v42  ;;  %1143 = vpow2.f32 %v575_v40  ;;  %v483_v52 = vmul.f32 %v81_v13, %v1643_v0 }
  0x81   :  { %v938_v47 = vsel %vm927_vm1, %v912_v39, 0.0  ;;  %v853_v30 = vmul.f32 %v835_v55, %v817_v34  ;;  %v698_v12 = vmul.f32 0.6931472, %v1134_v58  ;;  %v573_v60 = vmul.f32 1.442695, %v540_v50 }
  0x82   :  { %v1136_v54 = vpop.eup %1135  ;;  %939 = vadd.xlane.f32.xlu1 %v938_v47  ;;  %v909_v56 = vmul.f32 %v1560_v17, %v867_v59  ;;  %v832_v16 = vmul.f32 0.25, %v814_v48  ;;  %v795_v51 = vmul.f32 1.442695, %v768_v31  ;;  %v1749_v25 = vsub.f32 %v465_v11, %v483_v52  ;;  %v1758_v55 = vld [vmem:[#allocation2 + $0x35] sm:$0xf]  ;;  %v84_v59 = vld [vmem:[#allocation4 + $0xa5] sm:$0xff] }
  0x83   :  { %v1734_v18 = vpop.eup %1137  ;;  %v871_v10 = vmul.f32 %v853_v30, %v1646_v27  ;;  %v820_v61 = vsub.f32 1.0, %v1136_v54  ;;  %v704_v20 = vsel %vm1725_vm3, %v701_v45, %v698_v12  ;;  %1145 = vpow2.f32 %v573_v60 }
  0x84   :  { %v1140_v33 = vpop.eup %1139  ;;  %v928_v43 = vsel %vm927_vm1, %v909_v56, 0.0  ;;  %v850_v57 = vmul.f32 %v832_v16, %v814_v48  ;;  %1147 = vpow2.f32 %v795_v51  ;;  %v1741_v41 = vadd.f32 %v704_v20, %v1701_v24 }
  0x85   :  { %929 = vadd.xlane.f32.xlu0 %v928_v43  ;;  %v913_v0 = vmul.f32 %v1549_v6, %v871_v10  ;;  %v838_v46 = vmul.f32 0.25, %v820_v61  ;;  %v819_v7 = vsub.f32 1.0, %v1140_v33  ;;  %v687_v27 = vadd.f32 1.0, %v1734_v18 }
  0x86   :  { %v868_v22 = vmul.f32 %v850_v57, %v1655_v5  ;;  %v772_v23 = vsub.f32 0.0, %v1741_v41  ;;  %v690_v63 = vmul.f32 -0.5, %v1734_v18  ;;  %vm98_vm4 = vcmp.gt.f32.partialorder %v1745_v21, 0.0 }
  0x87   :  { %v1142_v24 = vpop.eup %1141  ;;  %v941_v14 = vsel %vm927_vm1, %v913_v0, 0.0  ;;  %v856_v34 = vmul.f32 %v838_v46, %v820_v61  ;;  %v837_v38 = vmul.f32 0.25, %v819_v7  ;;  %1149 = vlog2.f32 %v687_v27  ;;  %v74_v46 = vld [vmem:[#allocation4 + $0x35] sm:$0xf] }
  0x88   :  { %942 = vadd.xlane.f32.xlu1 %v941_v14  ;;  %v910_v44 = vmul.f32 %v1560_v17, %v868_v22  ;;  %v823_v45 = vsub.f32 1.0, %v1142_v24  ;;  %v803_v40 = vmul.f32 1.442695, %v772_v23  ;;  %v469_v36 = vmax.f32 %v1688_v53, 0.0  ;;  %v1788_v27 = vld [vmem:[#allocation2 + $0x15] sm:$0xf] }
  0x89   :  { %v874_v5 = vmul.f32 %v856_v34, %v1668_v8  ;;  %v855_v11 = vmul.f32 %v837_v38, %v819_v7  ;;  %v487_v39 = vmul.f32 %v85_v32, %v1688_v53  ;;  %v693_v58 = vand.u32 2147483647, %v1734_v18  ;;  %v1790_v22 = vld [vmem:[#allocation2 + $0x75] sm:$0xf] }
  0x8a   :  { %v1760_v2 = vpop.eup %1143  ;;  %v931_v13 = vsel %vm927_vm1, %v910_v44, 0.0  ;;  %v841_v50 = vmul.f32 0.25, %v823_v45  ;;  %1151 = vpow2.f32 %v803_v40  ;;  %v691_v31 = vadd.f32 1.0, %v690_v63  ;;  %v1821_v0 = vld [vmem:[#allocation2 + $0xb5] sm:$0xf] }
  0x8b   :  { %932 = vadd.xlane.f32.xlu0 %v931_v13  ;;  %v916_v48 = vmul.f32 %v1580_v49, %v874_v5  ;;  %v873_v8 = vmul.f32 %v855_v11, %v1679_v29  ;;  %v723_v47 = vadd.f32 1.0, %v1760_v2  ;;  %v1770_v30 = vsel %vm98_vm4, 1.0, %v1259_v4 }
  0x8c   :  { %v859_v53 = vmul.f32 %v841_v50, %v823_v45  ;;  %v468_v12 = vmax.f32 %v1709_v35, 0.0  ;;  %v512_v60 = vand.u32 2147483647, %v1758_v55  ;;  %v486_v29 = vmul.f32 %v84_v59, %v1709_v35 }
  0x8d   :  { %v1146_v54 = vpop.eup %1145  ;;  %v950_v56 = vsel %vm927_vm1, %v916_v48, 0.0  ;;  %v915_v16 = vmul.f32 %v1580_v49, %v873_v8  ;;  %1153 = vlog2.f32 %v723_v47  ;;  %v1778_v10 = vsub.f32 %v469_v36, %v487_v39 }
  0x8e   :  { %v1148_v51 = vpop.eup %1147  ;;  %951 = vadd.xlane.f32.xlu1 %v950_v56  ;;  %v877_v52 = vmul.f32 %v859_v53, %v1691_v15  ;;  %v726_v61 = vmul.f32 -0.5, %v1760_v2  ;;  %v714_v20 = vadd.f32 1.0, %v1146_v54  ;;  %v692_v57 = vmul.f32 %v1734_v18, %v691_v31  ;;  %v1806_v31 = vld [vmem:[#allocation2 + $0x55] sm:$0xf] }
  0x8f   :  { %v947_v33 = vsel %vm927_vm1, %v915_v16, 0.0  ;;  %v822_v43 = vsub.f32 1.0, %v1148_v51  ;;  %vm1783_vm5 = vcmp.lt.f32.partialorder %v693_v58, 0.0004427343  ;;  %v717_v15 = vmul.f32 -0.5, %v1146_v54 }
  0x90   :  { %948 = vadd.xlane.f32.xlu0 %v947_v33  ;;  %v919_v35 = vmul.f32 %v1588_v28, %v877_v52  ;;  %1155 = vlog2.f32 %v714_v20  ;;  %v530_v7 = vsub.f32 0.0, %v512_v60  ;;  %v729_v32 = vand.u32 2147483647, %v1760_v2 }
  0x91   :  { %v1150_v23 = vpop.eup %1149  ;;  %v840_v63 = vmul.f32 0.25, %v822_v43  ;;  %v504_v18 = vsub.f32 %v468_v12, %v486_v29  ;;  %v720_v24 = vand.u32 2147483647, %v1146_v54  ;;  %v727_v38 = vadd.f32 1.0, %v726_v61  ;;  %v71_v29 = vld [vmem:[#allocation4 + $0x15] sm:$0xf] }
  0x92   :  { %v959_v14 = vsel %vm927_vm1, %v919_v35, 0.0  ;;  %v689_v34 = vmul.f32 0.6931472, %v1150_v23  ;;  %v553_v44 = vmul.f32 1.442695, %v530_v7  ;;  %v458_v40 = vmax.f32 %v1758_v55, 0.0 }
  0x93   :  { %960 = vadd.xlane.f32.xlu1 %v959_v14  ;;  %v858_v45 = vmul.f32 %v840_v63, %v822_v43  ;;  %v1796_v5 = vmul.f32 %v74_v46, %v1758_v55  ;;  %v509_v11 = vand.u32 2147483647, %v1788_v27  ;;  %v718_v13 = vadd.f32 1.0, %v717_v15  ;;  %v80_v7 = vld [vmem:[#allocation4 + $0x75] sm:$0xf] }
  0x94   :  { %v1152_v36 = vpop.eup %1151  ;;  %v695_v39 = vsel %vm1783_vm5, %v692_v57, %v689_v34  ;;  %1157 = vpow2.f32 %v553_v44  ;;  %v518_v50 = vand.u32 2147483647, %v1790_v22  ;;  %v728_v47 = vmul.f32 %v1760_v2, %v727_v38 }
  0x95   :  { %v876_v58 = vmul.f32 %v858_v45, %v1721_v42  ;;  %v826_v59 = vsub.f32 1.0, %v1152_v36  ;;  %v1804_v48 = vadd.f32 %v695_v39, %v1749_v25  ;;  %v527_v8 = vsub.f32 0.0, %v509_v11 }
  0x96   :  { %vm1809_vm6 = vcmp.lt.f32.partialorder %v729_v32, 0.0004427343  ;;  %vm1813_vm7 = vcmp.lt.f32.partialorder %v720_v24, 0.0004427343  ;;  %v536_v60 = vsub.f32 0.0, %v518_v50  ;;  %v719_v61 = vmul.f32 %v1146_v54, %v718_v13 }
  0x97   :  { %v1154_v56 = vpop.eup %1153  ;;  %v918_v42 = vmul.f32 %v1588_v28, %v876_v58  ;;  %v844_v16 = vmul.f32 0.25, %v826_v59  ;;  %v771_v25 = vsub.f32 0.0, %v1804_v48  ;;  %v547_v51 = vmul.f32 1.442695, %v527_v8  ;;  %v77_v24 = vld [vmem:[#allocation4 + $0x55] sm:$0xf] }
  0x98   :  { %v725_v52 = vmul.f32 0.6931472, %v1154_v56  ;;  %v565_v2 = vmul.f32 1.442695, %v536_v60  ;;  %v515_v20 = vand.u32 2147483647, %v1806_v31  ;;  %v473_v14 = vmul.f32 %v71_v29, %v1788_v27 }
  0x99   :  { %v956_v33 = vsel %vm927_vm1, %v918_v42, 0.0  ;;  %v862_v43 = vmul.f32 %v844_v16, %v826_v59  ;;  %v801_v57 = vmul.f32 1.442695, %v771_v25  ;;  %1159 = vpow2.f32 %v547_v51  ;;  %v1842_v50 = vld [vmem:[#allocation2 + $0x95] sm:$0xf] }
  0x9a   :  { %v1156_v46 = vpop.eup %1155  ;;  %957 = vadd.xlane.f32.xlu0 %v956_v33  ;;  %v731_v35 = vsel %vm1809_vm6, %v728_v47, %v725_v52  ;;  %v455_v15 = vmax.f32 %v1788_v27, 0.0  ;;  %1161 = vpow2.f32 %v565_v2  ;;  %v533_v54 = vsub.f32 0.0, %v515_v20  ;;  %v86_v25 = vld [vmem:[#allocation4 + $0xb5] sm:$0xf] }
  0x9b   :  { %v880_v23 = vmul.f32 %v862_v43, %v1741_v41  ;;  %1163 = vpow2.f32 %v801_v57  ;;  %v1828_v63 = vadd.f32 %v731_v35, %v1778_v10  ;;  %v716_v32 = vmul.f32 0.6931472, %v1156_v46 }
  0x9c   :  { %v464_v34 = vmax.f32 %v1790_v22, 0.0  ;;  %v559_v38 = vmul.f32 1.442695, %v533_v54  ;;  %v524_v44 = vand.u32 2147483647, %v1821_v0  ;;  %vm116_vm13 = vcmp.eq.f32.partialorder %v1745_v21, 0.0 }
  0x9d   :  { %v922_v45 = vmul.f32 %v1714_v19, %v880_v23  ;;  %v775_v11 = vsub.f32 0.0, %v1828_v63  ;;  %v722_v41 = vsel %vm1813_vm7, %v719_v61, %v716_v32  ;;  %v482_v10 = vmul.f32 %v80_v7, %v1790_v22 }
  0x9e   :  { %v1158_v36 = vpop.eup %1157  ;;  %v1839_v39 = vadd.f32 %v722_v41, %v504_v18  ;;  %v461_v27 = vmax.f32 %v1806_v31, 0.0  ;;  %1165 = vpow2.f32 %v559_v38  ;;  %v542_v13 = vsub.f32 0.0, %v524_v44  ;;  %v1870_v38 = vld [vmem:[#allocation2 + $0xa0] sm:$0x1f] }
  0x9f   :  { %v968_v58 = vsel %vm927_vm1, %v922_v45, 0.0  ;;  %v809_v59 = vmul.f32 1.442695, %v775_v11  ;;  %v624_v8 = vadd.f32 1.0, %v1158_v36  ;;  %v479_v47 = vmul.f32 %v77_v24, %v1806_v31 }
  0xa0   :  { %969 = vadd.xlane.f32.xlu1 %v968_v58  ;;  %v1848_v53 = vrot.slane %v1770_v30, %v1303_v3  ;;  %v774_v22 = vsub.f32 0.0, %v1839_v39  ;;  %v1854_v18 = vsub.f32 %v458_v40, %v1796_v5  ;;  %v577_v12 = vmul.f32 1.442695, %v542_v13 }
  0xa1   :  { %1167 = vpow2.f32 %v809_v59  ;;  %v1856_v60 = vsub.f32 %v455_v15, %v473_v14  ;;  %v1858_v56 = vsub.f32 %v464_v34, %v482_v10  ;;  %v521_v31 = vand.u32 2147483647, %v1842_v50 }
  0xa2   :  { %v807_v42 = vmul.f32 1.442695, %v774_v22  ;;  %1169 = vlog2.f32 %v624_v8  ;;  %v627_v16 = vmul.f32 -0.5, %v1158_v36  ;;  %vm140_vm11 = vcmp.gt.f32.partialorder %v1770_v30, 0.0 }
  0xa3   :  { %v1160_v29 = vpop.eup %1159  ;;  %v1862_v51 = vsub.f32 %v461_v27, %v479_v47  ;;  %v470_v55 = vmax.f32 %v1821_v0, 0.0  ;;  %1171 = vpow2.f32 %v577_v12  ;;  %v539_v40 = vsub.f32 0.0, %v521_v31 }
  0xa4   :  { %v1162_v5 = vpop.eup %1161  ;;  %1173 = vpow2.f32 %v807_v42  ;;  %v597_v52 = vadd.f32 1.0, %v1160_v29  ;;  %v600_v61 = vmul.f32 -0.5, %v1160_v29  ;;  %v146_v2 = vsel %vm140_vm11, 1, %v1260_v9 }
  0xa5   :  { %v1164_v20 = vpop.eup %1163  ;;  %v678_v33 = vadd.f32 1.0, %v1162_v5  ;;  %v681_v43 = vmul.f32 -0.5, %v1162_v5  ;;  %v1867_v57 = vmul.f32 %v86_v25, %v1821_v0  ;;  %v571_v46 = vmul.f32 1.442695, %v539_v40 }
  0xa6   :  { %v825_v35 = vsub.f32 1.0, %v1164_v20  ;;  %v628_v15 = vadd.f32 1.0, %v627_v16  ;;  %v630_v7 = vand.u32 2147483647, %v1158_v36  ;;  %1175 = vlog2.f32 %v597_v52  ;;  %v1895_v16 = vld [vmem:[#allocation4 + $0xa0] sm:$0x1f] }
  0xa7   :  { %v603_v54 = vand.u32 2147483647, %v1160_v29  ;;  %1177 = vlog2.f32 %v678_v33  ;;  %v684_v23 = vand.u32 2147483647, %v1162_v5  ;;  %v170_v32 = vrot.slane %v146_v2, %v1303_v3 }
  0xa8   :  { %v1166_v24 = vpop.eup %1165  ;;  %v843_v14 = vmul.f32 0.25, %v825_v35  ;;  %v601_v34 = vadd.f32 1.0, %v600_v61  ;;  %1179 = vpow2.f32 %v571_v46  ;;  %v1068_v44 = vsel %vm116_vm13, 1.0, %v1259_v4 }
  0xa9   :  { %v682_v45 = vadd.f32 1.0, %v681_v43  ;;  %v651_v11 = vadd.f32 1.0, %v1166_v24  ;;  %v654_v41 = vmul.f32 -0.5, %v1166_v24  ;;  %v657_v10 = vand.u32 2147483647, %v1166_v24 }
  0xaa   :  { %v861_v27 = vmul.f32 %v843_v14, %v825_v35  ;;  %v629_v13 = vmul.f32 %v1158_v36, %v628_v15  ;;  %vm1875_vm12 = vcmp.lt.f32.partialorder %v630_v7, 0.0004427343  ;;  %vm1879_vm14 = vcmp.eq.s32.totalorder %v170_v32, 1 }
  0xab   :  { %v1168_v8 = vpop.eup %1167  ;;  %vm1883_vm15 = vcmp.lt.f32.partialorder %v603_v54, 0.0004427343  ;;  %vm1887_vm0 = vcmp.lt.f32.partialorder %v684_v23, 0.0004427343  ;;  %1181 = vlog2.f32 %v651_v11  ;;  %v182_v36 = vsel %vm1879_vm14, %v1870_v38, 1.0 }
  0xac   :  { %v1170_v22 = vpop.eup %1169  ;;  %v879_v12 = vmul.f32 %v861_v27, %v1804_v48  ;;  %v829_v31 = vsub.f32 1.0, %v1168_v8  ;;  %v602_v42 = vmul.f32 %v1160_v29, %v601_v34  ;;  %v1897_v25 = vmul.f32 0.5, %v1068_v44 }
  0xad   :  { %v1899_v40 = vpop.eup %1171  ;;  %v626_v52 = vmul.f32 0.6931472, %v1170_v22  ;;  %v683_v61 = vmul.f32 %v1162_v5, %v682_v45  ;;  %v655_v2 = vadd.f32 1.0, %v654_v41  ;;  %vm1901_vm2 = vcmp.lt.f32.partialorder %v657_v10, 0.0004427343 }
  0xae   :  { %v1174_v33 = vpop.eup %1173  ;;  %v921_v43 = vmul.f32 %v1714_v19, %v879_v12  ;;  %v847_v46 = vmul.f32 0.25, %v829_v31  ;;  %v732_v48 = vadd.f32 1.0, %v1899_v40  ;;  %v1907_v29 = vadd.f32 1e-06, %v182_v36 }
  0xaf   :  { %v828_v35 = vsub.f32 1.0, %v1174_v33  ;;  %v632_v15 = vsel %vm1875_vm12, %v629_v13, %v626_v52  ;;  %v735_v7 = vmul.f32 -0.5, %v1899_v40  ;;  %v236_v5 = vsel %vm1879_vm14, %v1895_v16, 1.0 }
  0xb0   :  { %v1176_v54 = vpop.eup %1175  ;;  %v965_v23 = vsel %vm927_vm1, %v921_v43, 0.0  ;;  %v865_v32 = vmul.f32 %v847_v46, %v829_v31  ;;  %v1917_v14 = vadd.f32 %v632_v15, %v1854_v18  ;;  %1183 = vlog2.f32 %v732_v48  ;;  %v83_v31 = vld [vmem:[#allocation4 + $0x95] sm:$0xf] }
  0xb1   :  { %v1178_v34 = vpop.eup %1177  ;;  %966 = vadd.xlane.f32.xlu0 %v965_v23  ;;  %v846_v44 = vmul.f32 0.25, %v828_v35  ;;  %v599_v45 = vmul.f32 0.6931472, %v1176_v54  ;;  %v656_v11 = vmul.f32 %v1166_v24, %v655_v2  ;;  %v738_v41 = vand.u32 2147483647, %v1899_v40 }
  0xb2   :  { %v1180_v10 = vpop.eup %1179  ;;  %v883_v27 = vmul.f32 %v865_v32, %v1828_v63  ;;  %v764_v13 = vsub.f32 0.0, %v1917_v14  ;;  %v680_v58 = vmul.f32 0.6931472, %v1178_v34  ;;  %1185 = vrsqrt.f32 %v1907_v29 }
  0xb3   :  { %v864_v59 = vmul.f32 %v846_v44, %v828_v35  ;;  %v605_v18 = vsel %vm1883_vm15, %v602_v42, %v599_v45  ;;  %v736_v8 = vadd.f32 1.0, %v735_v7  ;;  %v705_v36 = vadd.f32 1.0, %v1180_v10 }
  0xb4   :  { %v925_v22 = vmul.f32 %v1848_v53, %v883_v27  ;;  %v787_v12 = vmul.f32 1.442695, %v764_v13  ;;  %v1927_v24 = vadd.f32 %v605_v18, %v1856_v60  ;;  %v686_v63 = vsel %vm1887_vm0, %v683_v61, %v680_v58  ;;  %v1972_v58 = vld [vmem:[#allocation2 + $0x80] sm:$0x1f] }
  0xb5   :  { %v1182_v52 = vpop.eup %1181  ;;  %v882_v2 = vmul.f32 %v864_v59, %v1839_v39  ;;  %v1933_v33 = vadd.f32 %v686_v63, %v1858_v56  ;;  %1187 = vlog2.f32 %v705_v36  ;;  %v708_v47 = vmul.f32 -0.5, %v1180_v10  ;;  %v1977_v36 = vld [vmem:[#allocation4 + $0x80] sm:$0x1f] }
  0xb6   :  { %v977_v42 = vsel %vm927_vm1, %v925_v22, 0.0  ;;  %1189 = vpow2.f32 %v787_v12  ;;  %v761_v43 = vsub.f32 0.0, %v1927_v24  ;;  %v653_v46 = vmul.f32 0.6931472, %v1182_v52 }
  0xb7   :  { %978 = vadd.xlane.f32.xlu1 %v977_v42  ;;  %v924_v60 = vmul.f32 %v1848_v53, %v882_v2  ;;  %v770_v21 = vsub.f32 0.0, %v1933_v33  ;;  %v467_v61 = vmax.f32 %v1842_v50, 0.0  ;;  %v485_v39 = vmul.f32 %v83_v31, %v1842_v50 }
  0xb8   :  { %v781_v48 = vmul.f32 1.442695, %v761_v43  ;;  %v659_v56 = vsel %vm1901_vm2, %v656_v11, %v653_v46  ;;  %v506_v35 = vsub.f32 %v470_v55, %v1867_v57  ;;  %v1946_v15 = vadd.f32 1e-06, %v236_v5 }
  0xb9   :  { %v974_v7 = vsel %vm927_vm1, %v924_v60, 0.0  ;;  %v799_v54 = vmul.f32 1.442695, %v770_v21  ;;  %v1950_v23 = vadd.f32 %v659_v56, %v1862_v51  ;;  %v737_v32 = vmul.f32 %v1899_v40, %v736_v8 }
  0xba   :  { %v1184_v34 = vpop.eup %1183  ;;  %975 = vadd.xlane.f32.xlu0 %v974_v7  ;;  %1191 = vpow2.f32 %v781_v48  ;;  %vm739_vm3 = vcmp.lt.f32.partialorder %v738_v41, 0.0004427343  ;;  %v709_v50 = vadd.f32 1.0, %v708_v47  ;;  %v1955_v20 = vadd.f32 %v1770_v30, %v1897_v25 }
  0xbb   :  { %1193 = vpow2.f32 %v799_v54  ;;  %v767_v0 = vsub.f32 0.0, %v1950_v23  ;;  %v734_v55 = vmul.f32 0.6931472, %v1184_v34  ;;  %v711_v57 = vand.u32 2147483647, %v1180_v10 }
  0xbc   :  { %v1186_v5 = vpop.eup %1185  ;;  %1195 = vrsqrt.f32 %v1946_v15  ;;  %vm115_vm1 = vcmp.eq.f32.partialorder %v1630_v37, 0.0  ;;  %v503_v44 = vsub.f32 %v467_v61, %v485_v39  ;;  %v710_v11 = vmul.f32 %v1180_v10, %v709_v50 }
  0xbd   :  { %v793_v51 = vmul.f32 1.442695, %v767_v0  ;;  %v740_v40 = vsel %vm739_vm3, %v737_v32, %v734_v55  ;;  %v1963_v41 = vmul.f32 5.0, %v1770_v30  ;;  %vm139_vm4 = vcmp.gt.f32.partialorder %v1696_v26, 0.0 }
  0xbe   :  { %v1960_v45 = vadd.f32 %v740_v40, %v506_v35  ;;  %vm1966_vm5 = vcmp.lt.f32.partialorder %v711_v57, 0.0004427343  ;;  %v348_v13 = vrot.slane %v1955_v20, %v1303_v3  ;;  %v145_v59 = vsel %vm139_vm4, 1, %v1260_v9 }
  0xbf   :  { %v1188_v25 = vpop.eup %1187  ;;  %1197 = vpow2.f32 %v793_v51  ;;  %vm934_vm6 = vcmask 396288   ;;  %v225_v8 = vmul.f32 %v1186_v5, %v1907_v29  ;;  %v166_v22 = vrot.slane %v145_v59, %v1303_v3 }
  0xc0   :  { %v1190_v18 = vpop.eup %1189  ;;  %v776_v30 = vsub.f32 0.0, %v1960_v45  ;;  %v707_v10 = vmul.f32 0.6931472, %v1188_v25  ;;  %vm226_vm7 = vcmp.eq.f32.partialorder %v1907_v29, inf  ;;  %vm228_vm13 = vcmp.eq.f32.partialorder %v1907_v29, 0.0 }
  0xc1   :  { %v818_v12 = vsub.f32 1.0, %v1190_v18  ;;  %v229_v63 = vand.u32 2147483648, %v1907_v29  ;;  %vm280_vm11 = vcmp.eq.f32.partialorder %v1946_v15, inf  ;;  %vm175_vm12 = vcmp.eq.s32.totalorder %v166_v22, 1 }
  0xc2   :  { %v811_v31 = vmul.f32 1.442695, %v776_v30  ;;  %v713_v9 = vsel %vm1966_vm5, %v710_v11, %v707_v10  ;;  %v181_v47 = vsel %vm175_vm12, %v1972_v58, 1.0  ;;  %v235_v42 = vsel %vm175_vm12, %v1977_v36, 1.0 }
  0xc3   :  { %v836_v52 = vmul.f32 0.25, %v818_v12  ;;  %v1986_v2 = vadd.f32 %v713_v9, %v503_v44  ;;  %v227_v46 = vsel %vm226_vm7, %v1907_v29, %v225_v8  ;;  %v1991_v60 = vadd.f32 1e-06, %v181_v47 }
  0xc4   :  { %v1192_v43 = vpop.eup %1191  ;;  %1199 = vpow2.f32 %v811_v31  ;;  %v1993_v21 = vadd.f32 1e-06, %v235_v42  ;;  %v1067_v35 = vsel %vm115_vm1, 1.0, %v1259_v4  ;;  %vm282_vm14 = vcmp.eq.f32.partialorder %v1946_v15, 0.0 }
  0xc5   :  { %v1194_v61 = vpop.eup %1193  ;;  %v854_v39 = vmul.f32 %v836_v52, %v818_v12  ;;  %v815_v48 = vsub.f32 1.0, %v1192_v43  ;;  %v773_v56 = vsub.f32 0.0, %v1986_v2  ;;  %v283_v32 = vand.u32 2147483648, %v1946_v15 }
  0xc6   :  { %v1196_v7 = vpop.eup %1195  ;;  %v824_v54 = vsub.f32 1.0, %v1194_v61  ;;  %1201 = vrsqrt.f32 %v1991_v60  ;;  %v230_v5 = vsel %vm228_vm13, %v229_v63, %v227_v46  ;;  %v309_v4 = vmul.f32 0.5, %v1067_v35 }
  0xc7   :  { %v872_v34 = vmul.f32 %v854_v39, %v1917_v14  ;;  %v833_v50 = vmul.f32 0.25, %v815_v48  ;;  %v805_v0 = vmul.f32 1.442695, %v773_v56  ;;  %v279_v55 = vmul.f32 %v1196_v7, %v1946_v15 }
  0xc8   :  { %v842_v57 = vmul.f32 0.25, %v824_v54  ;;  %1203 = vrsqrt.f32 %v1993_v21  ;;  %v372_v29 = vrot.slane %v1963_v41, %v1303_v3  ;;  %v292_v10 = vsel %vm1403_vm8, %v230_v5, %v1870_v38 }
  0xc9   :  { %v1198_v37 = vpop.eup %1197  ;;  %v914_v51 = vmul.f32 %v1549_v6, %v872_v34  ;;  %v851_v40 = vmul.f32 %v833_v50, %v815_v48  ;;  %1205 = vpow2.f32 %v805_v0  ;;  %v281_v14 = vsel %vm280_vm11, %v1946_v15, %v279_v55 }
  0xca   :  { %v860_v44 = vmul.f32 %v842_v57, %v824_v54  ;;  %v821_v11 = vsub.f32 1.0, %v1198_v37  ;;  %v284_v25 = vsel %vm282_vm14, %v283_v32, %v281_v14  ;;  %v321_v6 = vmul.f32 5.0, %v1696_v26 }
  0xcb   :  { %v944_v27 = vsel %vm934_vm6, %v914_v51, 0.0  ;;  %v869_v59 = vmul.f32 %v851_v40, %v1927_v24  ;;  %v298_v15 = vsel %vm1403_vm8, %v284_v25, %v1895_v16  ;;  %v315_v8 = vadd.f32 %v1696_v26, %v309_v4 }
  0xcc   :  { %945 = vadd.xlane.f32.xlu1 %v944_v27  ;;  %v878_v18 = vmul.f32 %v860_v44, %v1933_v33  ;;  %v839_v30 = vmul.f32 0.25, %v821_v11  ;;  %v378_v33 = vsel %vm134_vm10, %v348_v13, %v372_v29  ;;  %v304_v31 = vsub.f32 %v292_v10, %v298_v15 }
  0xcd   :  { %v911_v41 = vmul.f32 %v1560_v17, %v869_v59  ;;  %v368_v16 = vrot.slane %v321_v6, %v1303_v3  ;;  %vm219_vm15 = vcmp.eq.f32.partialorder %v1991_v60, inf  ;;  %vm221_vm0 = vcmp.eq.f32.partialorder %v1991_v60, 0.0 }
  0xce   :  { %v1200_v22 = vpop.eup %1199  ;;  %v920_v24 = vmul.f32 %v1588_v28, %v878_v18  ;;  %v857_v12 = vmul.f32 %v839_v30, %v821_v11  ;;  %v222_v28 = vand.u32 2147483648, %v1991_v60  ;;  %v344_v52 = vrot.slane %v315_v8, %v1303_v3 }
  0xcf   :  { %v935_v38 = vsel %vm934_vm6, %v911_v41, 0.0  ;;  %v830_v63 = vsub.f32 1.0, %v1200_v22  ;;  %vm273_vm2 = vcmp.eq.f32.partialorder %v1993_v21, inf  ;;  %vm275_vm3 = vcmp.eq.f32.partialorder %v1993_v21, 0.0 }
  0xd0   :  { %v1202_v9 = vpop.eup %1201  ;;  %936 = vadd.xlane.f32.xlu0 %v935_v38  ;;  %v962_v17 = vsel %vm934_vm6, %v920_v24, 0.0  ;;  %v875_v26 = vmul.f32 %v857_v12, %v1950_v23  ;;  %v276_v23 = vand.u32 2147483648, %v1993_v21  ;;  %v384_v61 = vmul.f32 %v378_v33, %v304_v31 }
  0xd1   :  { %963 = vadd.xlane.f32.xlu1 %v962_v17  ;;  %v848_v20 = vmul.f32 0.25, %v830_v63  ;;  %v218_v13 = vmul.f32 %v1202_v9, %v1991_v60  ;;  %v377_v55 = vsel %vm134_vm10, %v344_v52, %v368_v16  ;;  %vm410_vm10 = vcmask 1044480  }
  0xd2   :  { %v1204_v47 = vpop.eup %1203  ;;  %v917_v42 = vmul.f32 %v1580_v49, %v875_v26 }
  0xd3   :  { %v1206_v43 = vpop.eup %1205  ;;  %v866_v46 = vmul.f32 %v848_v20, %v830_v63  ;;  %v220_v39 = vsel %vm219_vm15, %v1991_v60, %v218_v13  ;;  %v272_v48 = vmul.f32 %v1204_v47, %v1993_v21  ;;  %v390_v60 = vmul.f32 %v384_v61, %v304_v31 }
  0xd4   :  { %v953_v56 = vsel %vm934_vm6, %v917_v42, 0.0  ;;  %v827_v35 = vsub.f32 1.0, %v1206_v43  ;;  %v223_v3 = vsel %vm221_vm0, %v222_v28, %v220_v39 }
  0xd5   :  { %954 = vadd.xlane.f32.xlu0 %v953_v56  ;;  %v884_v49 = vmul.f32 %v866_v46, %v1960_v45  ;;  %v274_v7 = vsel %vm273_vm2, %v1993_v21, %v272_v48  ;;  %v291_v54 = vsel %vm1403_vm8, %v223_v3, %v1972_v58  ;;  %v407_v4 = vsel %vm391_vm9, %v390_v60, 0.0 }
  0xd6   :  { %v845_v32 = vmul.f32 0.25, %v827_v35  ;;  %v277_v34 = vsel %vm275_vm3, %v276_v23, %v274_v7  ;;  %v397_v62 = vpop.xlane.xlu1 %396 }
  0xd7   :  { %v926_v50 = vmul.f32 %v1848_v53, %v884_v49  ;;  %v297_v0 = vsel %vm1403_vm8, %v277_v34, %v1977_v36  ;;  %v418_v18 = vsel %vm410_vm10, %v397_v62, 0.0  ;;  %vm984_vm8 = vcmask 1043456  }
  0xd8   :  { %v863_v57 = vmul.f32 %v845_v32, %v827_v35  ;;  %v303_v45 = vsub.f32 %v291_v54, %v297_v0  ;;  %v394_v36 = vpop.xlane.xlu0 %393  ;;  %v419_v30 = vrot.slane %v418_v18, 4 }
  0xd9   :  { %v980_v21 = vsel %vm934_vm6, %v926_v50, 0.0  ;;  %v411_v15 = vsel %vm410_vm10, %v394_v36, 0.0 }
  0xda   :  { %981 = vadd.xlane.f32.xlu1 %v980_v21  ;;  %v881_v5 = vmul.f32 %v863_v57, %v1986_v2  ;;  %v383_v58 = vmul.f32 %v377_v55, %v303_v45  ;;  %v420_v22 = vadd.f32 %v419_v30, %v418_v18  ;;  %v412_v24 = vrot.slane %v411_v15, 4 }
  0xdc   :  { %v923_v53 = vmul.f32 %v1714_v19, %v881_v5  ;;  %v389_v37 = vmul.f32 %v383_v58, %v303_v45  ;;  %v421_v63 = vrot.slane %v420_v22, 2  ;;  %v413_v9 = vadd.f32 %v412_v24, %v411_v15 }
  0xde   :  { %v971_v51 = vsel %vm934_vm6, %v923_v53, 0.0  ;;  %408 = vadd.xlane.f32.xlu1 %v407_v4  ;;  %v404_v1 = vsel %vm391_vm9, %v389_v37, 0.0  ;;  %v403_v40 = vpop.xlane.xlu1 %402  ;;  %v422_v13 = vadd.f32 %v421_v63, %v420_v22  ;;  %v414_v23 = vrot.slane %v413_v9, 2 }
  0xdf   :  { %972 = vadd.xlane.f32.xlu0 %v971_v51  ;;  %v432_v41 = vsel %vm410_vm10, %v403_v40, 0.0  ;;  %vm1044_vm9 = vcmask 0  }
  0xe0   :  { %v433_v12 = vrot.slane %v432_v41, 4  ;;  %v423_v7 = vrot.slane %v422_v13, 1  ;;  %v415_v34 = vadd.f32 %v414_v23, %v413_v9 }
  0xe2   :  { %v434_v17 = vadd.f32 %v433_v12, %v432_v41  ;;  %v424_v53 = vadd.f32 %v423_v7, %v422_v13 }
  0xe3   :  { %405 = vadd.xlane.f32.xlu0 %v404_v1  ;;  %v416_v1 = vrot.slane %v415_v34, 1 }
  0xe4   :  { %v435_v43 = vrot.slane %v434_v17, 2 }
  0xe5   :  { %v417_v15 = vadd.f32 %v416_v1, %v415_v34 }
  0xe6   :  { %v400_v14 = vpop.xlane.xlu0 %399  ;;  %v436_v50 = vadd.f32 %v435_v43, %v434_v17 }
  0xe7   :  { %v425_v38 = vsel %vm410_vm10, %v400_v14, 0.0 }
  0xe8   :  { %v426_v28 = vrot.slane %v425_v38, 4  ;;  %v437_v62 = vrot.slane %v436_v50, 1 }
  0xea   :  { %v427_v48 = vadd.f32 %v426_v28, %v425_v38  ;;  %v438_v24 = vadd.f32 %v437_v62, %v436_v50 }
  0xec   :  { %v428_v57 = vrot.slane %v427_v48, 2 }
  0xee   :  { %v429_v14 = vadd.f32 %v428_v57, %v427_v48 }
  0xf0   :  { %v430_v12 = vrot.slane %v429_v14, 1 }
 0x10f   :  { %v940_v44 = vpop.xlane.xlu1 %939 }
 0x112   :  { %v930_v11 = vpop.xlane.xlu0 %929 }
 0x115   :  { %v943_v2 = vpop.xlane.xlu1 %942 }
 0x116   :  { %v993_v31 = vadd.f32 %v943_v2, %v940_v44 }
 0x118   :  { %v933_v25 = vpop.xlane.xlu0 %932 }
 0x119   :  { %v983_v52 = vadd.f32 %v933_v25, %v930_v11 }
 0x11b   :  { %v952_v29 = vpop.xlane.xlu1 %951 }
 0x11d   :  { %v949_v27 = vpop.xlane.xlu0 %948 }
 0x11e   :  { %v1002_v60 = vadd.f32 %v952_v29, %v949_v27 }
 0x120   :  { %v961_v59 = vpop.xlane.xlu1 %960 }
 0x127   :  { %v958_v19 = vpop.xlane.xlu0 %957 }
 0x128   :  { %v1011_v46 = vadd.f32 %v961_v59, %v958_v19 }
 0x12d   :  { %v2066_v6 = vpop.xlane.xlu1 %969 }
 0x13e   :  { %v2069_v10 = vpop.xlane.xlu0 %966 }
 0x13f   :  { %v1020_v63 = vadd.f32 %v2066_v6, %v2069_v10  ;;  %v431_v10 = vadd.f32 %v430_v12, %v429_v14 }
 0x144   :  { %v979_v8 = vpop.xlane.xlu1 %978 }
 0x147   :  { %v976_v33 = vpop.xlane.xlu0 %975 }
 0x148   :  { %v1029_v44 = vadd.f32 %v979_v8, %v976_v33 }
 0x159   :  { %v946_v16 = vpop.xlane.xlu1 %945 }
 0x15a   :  { %v994_v26 = vsel %vm984_vm8, %v946_v16, 0.0 }
 0x15b   :  { %v995_v20 = vadd.f32 %v994_v26, %v993_v31 }
 0x15d   :  { %v996_v47 = vrot.slane %v995_v20, 4  ;;  %v937_v42 = vpop.xlane.xlu0 %936 }
 0x15e   :  { %v985_v61 = vsel %vm984_vm8, %v937_v42, 0.0  ;;  %v964_v39 = vpop.xlane.xlu1 %963 }
 0x15f   :  { %v997_v56 = vadd.f32 %v996_v47, %v995_v20  ;;  %v986_v35 = vadd.f32 %v985_v61, %v983_v52  ;;  %v1012_v3 = vsel %vm984_vm8, %v964_v39, 0.0 }
 0x160   :  { %v1013_v49 = vadd.f32 %v1012_v3, %v1011_v46 }
 0x161   :  { %v998_v54 = vrot.slane %v997_v56, 2  ;;  %v987_v32 = vrot.slane %v986_v35, 4 }
 0x162   :  { %v1014_v0 = vrot.slane %v1013_v49, 4  ;;  %v955_v55 = vpop.xlane.xlu0 %954 }
 0x163   :  { %v999_v45 = vadd.f32 %v998_v54, %v997_v56  ;;  %v988_v21 = vadd.f32 %v987_v32, %v986_v35  ;;  %v1003_v5 = vsel %vm984_vm8, %v955_v55, 0.0 }
 0x164   :  { %v1015_v58 = vadd.f32 %v1014_v0, %v1013_v49  ;;  %v1004_v4 = vadd.f32 %v1003_v5, %v1002_v60 }
 0x165   :  { %v1000_v37 = vrot.slane %v999_v45, 1  ;;  %v989_v51 = vrot.slane %v988_v21, 2 }
 0x166   :  { %v1016_v36 = vrot.slane %v1015_v58, 2  ;;  %v1005_v40 = vrot.slane %v1004_v4, 4 }
 0x167   :  { %v1001_v11 = vadd.f32 %v1000_v37, %v999_v45  ;;  %v990_v2 = vadd.f32 %v989_v51, %v988_v21  ;;  %v982_v25 = vpop.xlane.xlu1 %981 }
 0x168   :  { %v1017_v29 = vadd.f32 %v1016_v36, %v1015_v58  ;;  %v1006_v27 = vadd.f32 %v1005_v40, %v1004_v4  ;;  %v1030_v59 = vsel %vm984_vm8, %v982_v25, 0.0 }
 0x169   :  { %v1039_v19 = vadd.f32 %v1001_v11, %v424_v53  ;;  %v991_v18 = vrot.slane %v990_v2, 1  ;;  %v1031_v30 = vadd.f32 %v1030_v59, %v1029_v44 }
 0x16a   :  { %v1018_v41 = vrot.slane %v1017_v29, 1  ;;  %v1007_v22 = vrot.slane %v1006_v27, 2 }
 0x16b   :  { %1046 = vst.msk [vmem:[%s2110_s2 + $0x1] sm:$0x1] %vm1044_vm9, %v1039_v19  ;;  %v992_v8 = vadd.f32 %v991_v18, %v990_v2  ;;  %v1032_v33 = vrot.slane %v1031_v30, 4  ;;  %v409_v38 = vpop.xlane.xlu1 %408 }
 0x16c   :  { %v1019_v31 = vadd.f32 %v1018_v41, %v1017_v29  ;;  %v1008_v16 = vadd.f32 %v1007_v22, %v1006_v27  ;;  %v973_v9 = vpop.xlane.xlu0 %972  ;;  %v446_v17 = vsel %vm410_vm10, %v409_v38, 0.0 }
 0x16d   :  { %v1038_v26 = vadd.f32 %v992_v8, %v417_v15  ;;  %v1033_v28 = vadd.f32 %v1032_v33, %v1031_v30  ;;  %v1021_v20 = vsel %vm984_vm8, %v973_v9, 0.0  ;;  %v447_v13 = vrot.slane %v446_v17, 4 }
 0x16e   :  { %v1041_v52 = vadd.f32 %v1019_v31, %v438_v24  ;;  %v1009_v47 = vrot.slane %v1008_v16, 1  ;;  %v1022_v42 = vadd.f32 %v1021_v20, %v1020_v63 }
 0x16f   :  { %1045 = vst.msk [vmem:[%s2110_s2] sm:$0x1] %vm1044_vm9, %v1038_v26  ;;  %v1034_v23 = vrot.slane %v1033_v28, 2  ;;  %v448_v6 = vadd.f32 %v447_v13, %v446_v17 }
 0x170   :  { %1048 = vst.msk [vmem:[%s2110_s2 + $0x3] sm:$0x1] %vm1044_vm9, %v1041_v52  ;;  %v1010_v43 = vadd.f32 %v1009_v47, %v1008_v16  ;;  %v1023_v46 = vrot.slane %v1022_v42, 4  ;;  %v406_v61 = vpop.xlane.xlu0 %405 }
 0x171   :  { %v1035_v39 = vadd.f32 %v1034_v23, %v1033_v28  ;;  %v449_v48 = vrot.slane %v448_v6, 2  ;;  %v439_v56 = vsel %vm410_vm10, %v406_v61, 0.0 }
 0x172   :  { %v1040_v35 = vadd.f32 %v1010_v43, %v431_v10  ;;  %v1024_v3 = vadd.f32 %v1023_v46, %v1022_v42  ;;  %v440_v49 = vrot.slane %v439_v56, 4 }
 0x173   :  { %v1036_v7 = vrot.slane %v1035_v39, 1  ;;  %v450_v54 = vadd.f32 %v449_v48, %v448_v6 }
 0x174   :  { %1047 = vst.msk [vmem:[%s2110_s2 + $0x2] sm:$0x1] %vm1044_vm9, %v1040_v35  ;;  %v1025_v32 = vrot.slane %v1024_v3, 2  ;;  %v441_v34 = vadd.f32 %v440_v49, %v439_v56 }
 0x175   :  { %v451_v50 = vrot.slane %v450_v54, 1  ;;  %v1037_v55 = vadd.f32 %v1036_v7, %v1035_v39 }
 0x176   :  { %v1026_v60 = vadd.f32 %v1025_v32, %v1024_v3  ;;  %v442_v0 = vrot.slane %v441_v34, 2 }
 0x177   :  { %v452_v57 = vadd.f32 %v451_v50, %v450_v54 }
 0x178   :  { %v1027_v45 = vrot.slane %v1026_v60, 1  ;;  %v443_v21 = vadd.f32 %v442_v0, %v441_v34 }
 0x179   :  { %v1043_v5 = vadd.f32 %v1037_v55, %v452_v57 }
 0x17a   :  { %v444_v58 = vrot.slane %v443_v21, 1  ;;  %v1028_v4 = vadd.f32 %v1027_v45, %v1026_v60 }
 0x17b   :  { %1050 = vst.msk [vmem:[%s2110_s2 + $0x5] sm:$0x1] %vm1044_vm9, %v1043_v5 }
 0x17c   :  { %v445_v53 = vadd.f32 %v444_v58, %v443_v21 }
 0x17e   :  { %v1042_v37 = vadd.f32 %v1028_v4, %v445_v53 }
 0x180   :  { %1049 = vst.msk [vmem:[%s2110_s2 + $0x4] sm:$0x1] %vm1044_vm9, %v1042_v37 }
 0x181   :  { %1055 = vsyncpa [#allocation3], 1 }
 0x182   :  { %1056 = vsyncpa [#allocation5], 1 }

</bundles_post_ra>
